<compile_context>
chip_gen: v7x
topology: tpu7x:2x2x1
jax: 0.10.0
libtpu: 0.0.40
codegen_flags: <defaults>
</compile_context>

<pallas_src>
import jax
import jax.numpy as jnp
import numpy as np
from jax.experimental import pallas as pl
from jax.experimental.pallas import tpu as pltpu


def _round_up(a, m):
    return (a + m - 1) // m * m


# ------------- feature extractor: conv(3x3, valid) + bias + ReLU -------------

def _make_feat_kernel(tap_offs, tp, tpw, cfp):
    def kernel(x_ref, w_ref, b_ref, o_ref):
        # x_ref: (1, Cin, Hp)  bf16  -- flattened channel-major image, resident
        # w_ref: (T, Cfp, Cin) f32   -- per-tap weights (bf16-rounded values)
        # b_ref: (Cfp, 1)      f32
        # o_ref: (1, Cfp, TP)  bf16  -- channel-major feature tile (lane dense)
        base = pl.multiple_of(pl.program_id(1) * tp, 128)
        # One aligned window load per tile; the KH*KW tap shifts are static
        # lane slices of the in-register window (no HBM re-reads, no im2col).
        xw = x_ref[0, :, pl.ds(base, tpw)].astype(jnp.float32)    # (Cin, TPW)
        acc = jnp.zeros((cfp, tp), jnp.float32)
        for t, off in enumerate(tap_offs):                        # KH*KW taps
            xs = xw[:, off:off + tp]                              # (Cin, TP)
            acc = acc + jnp.dot(w_ref[t], xs,
                                preferred_element_type=jnp.float32)
        acc = jnp.maximum(acc + b_ref[...], 0.0)
        o_ref[0] = acc.astype(o_ref.dtype)
    return kernel


def feature_extractor(x_nchw, w, b, min_rows=0):
    """x: (N,Cin,H,W) f32; w: (KH,KW,Cin,Cf); b: (Cf,)
    -> (N, Cfp, rows_pad) bf16 channel-major feature map over full-width rows
    (row index = y*W + x; columns x >= Wo and rows >= Ho*W are garbage that
    downstream code never reads for valid outputs)."""
    n, cin, h, wdt = x_nchw.shape
    kh, kw, _, cf = w.shape
    ho = h - kh + 1
    cfp = _round_up(cf, 16)                   # bf16 sublane-dense channel count

    n_rows = ho * wdt                         # full-width output rows
    rows_needed = max(n_rows, min_rows)
    tp = min(512, _round_up(rows_needed, 128))        # spatial tile (lanes)
    rows_pad = _round_up(rows_needed, tp)
    num_pt = rows_pad // tp
    max_off = (kh - 1) * wdt + (kw - 1)
    slack = _round_up(max_off, 128)
    tpw = tp + slack                          # per-tile window incl. tap slack
    hp = rows_pad + slack                     # = (num_pt-1)*tp + tpw

    # Channel-major flattened image: NCHW is already channel-major, so this is
    # a reshape (no transpose), zero tail, bf16 (halves raw-image HBM traffic).
    x = x_nchw.reshape(n, cin, h * wdt)
    x = jnp.pad(x, ((0, 0), (0, 0), (0, hp - h * wdt))).astype(jnp.bfloat16)

    # Per-tap weights (T, Cfp, Cin); values rounded to bf16 (matches the bf16
    # reference) but carried f32 so the in-kernel math stays on the f32 path.
    wt = jnp.transpose(w, (0, 1, 3, 2)).reshape(kh * kw, cf, cin)
    wt = jnp.pad(wt, ((0, 0), (0, cfp - cf), (0, 0)))
    wt = wt.astype(jnp.bfloat16).astype(jnp.float32)
    bp = jnp.pad(b.astype(jnp.float32), (0, cfp - cf)).reshape(cfp, 1)

    tap_offs = tuple(ky * wdt + kx for ky in range(kh) for kx in range(kw))
    kernel = _make_feat_kernel(tap_offs, tp, tpw, cfp)

    return pl.pallas_call(
        kernel,
        out_shape=jax.ShapeDtypeStruct((n, cfp, rows_pad), jnp.bfloat16),
        grid=(n, num_pt),
        in_specs=[pl.BlockSpec((1, cin, hp), lambda i, j: (i, 0, 0)),
                  pl.BlockSpec((kh * kw, cfp, cin), lambda i, j: (0, 0, 0)),
                  pl.BlockSpec((cfp, 1), lambda i, j: (0, 0))],
        out_specs=pl.BlockSpec((1, cfp, tp), lambda i, j: (i, 0, j)),
        compiler_params=pltpu.CompilerParams(
            dimension_semantics=("parallel", "parallel"),
            vmem_limit_bytes=32 * 1024 * 1024),
    )(x, wt, bp)


# ----------------- connector: per-batch SiamFC cross-correlation -------------

def _make_xcorr_kernel(tap_offs, length, t2):
    def kernel(z_ref, x_ref, o_ref, proj_ref):
        # z_ref: (1, T2p, Cfp) bf16  -- compacted valid template taps
        # x_ref: (1, Cfp, RxP) bf16  -- search features, channel-major (as stored)
        # o_ref: (1, 1, L)     f32   -- flattened full-width score row (L % 128 == 0)
        # proj_ref: (T2p, RxP) f32 scratch
        # One MXU GEMM: every template tap against every search position, with
        # contraction K = Cfp (16) instead of 128 zero-padded channels.
        proj_ref[...] = jnp.dot(z_ref[0], x_ref[0],
                                preferred_element_type=jnp.float32)
        # Shift-and-add over the valid template taps; every add and the final
        # store are lane-dense (L is a multiple of 128).
        # TODO(synk): for large templates (t2 >> 64) switch to a fori_loop over
        # template rows with a strided pltpu.roll (sublane-dense adds) and tile
        # over search positions so the proj scratch stays bounded (v7x VMEM).
        acc = jnp.zeros((1, length), jnp.float32)
        for t in range(t2):
            acc = acc + proj_ref[pl.ds(t, 1), pl.ds(tap_offs[t], length)]
        o_ref[0] = acc
    return kernel


def connector(zt, xf, tap_offs, length):
    n, t2p, cfp = zt.shape
    _, _, rxp = xf.shape
    kernel = _make_xcorr_kernel(tap_offs, length, len(tap_offs))
    return pl.pallas_call(
        kernel,
        out_shape=jax.ShapeDtypeStruct((n, 1, length), jnp.float32),
        grid=(n,),
        in_specs=[pl.BlockSpec((1, t2p, cfp), lambda i: (i, 0, 0)),
                  pl.BlockSpec((1, cfp, rxp), lambda i: (i, 0, 0))],
        out_specs=pl.BlockSpec((1, 1, length), lambda i: (i, 0, 0)),
        scratch_shapes=[pltpu.VMEM((t2p, rxp), jnp.float32)],
        compiler_params=pltpu.CompilerParams(
            dimension_semantics=("parallel",),
            vmem_limit_bytes=32 * 1024 * 1024),
    )(zt, xf)


# --------------------------------- forward -----------------------------------

def siamfc_forward(template, search, w, b):
    n, _, th, tw = template.shape
    _, _, sh, sw = search.shape
    kh, kw, _, _ = w.shape

    hz, wzv = th - kh + 1, tw - kw + 1        # template feature (valid) dims
    hox, wx = sh - kh + 1, sw                 # search feature rows / full width
    wox = sw - kw + 1
    ho2, wo2 = hox - hz + 1, wox - wzv + 1    # score map dims
    t2 = hz * wzv
    length = _round_up(ho2 * wx, 128)         # lane-dense score row
    max_off = (hz - 1) * wx + (wzv - 1)

    zf = feature_extractor(template, w, b)
    # pad the search feature rows so every shifted proj window stays in bounds
    xf = feature_extractor(search, w, b, min_rows=max_off + length)
    # TODO(synk): fuse xf extraction into the xcorr kernel so the search
    # feature map never round-trips through HBM at all.

    # compact the (tiny) template feature to its valid taps: (N, T2p, Cfp)
    rows_idx = (jnp.arange(hz)[:, None] * tw
                + jnp.arange(wzv)[None, :]).reshape(-1)
    zt = jnp.transpose(zf[:, :, rows_idx], (0, 2, 1))
    t2p = _round_up(t2, 8)
    zt = jnp.pad(zt, ((0, 0), (0, t2p - t2), (0, 0)))

    tap_offs = tuple(ty * wx + tx for ty in range(hz) for tx in range(wzv))
    score = connector(zt, xf, tap_offs, length)           # (N, 1, L)
    # trim the tiny score map: full-width rows -> valid (Ho2, Wo2) NCHW map
    return score[:, :, :ho2 * wx].reshape(n, 1, ho2, wx)[:, :, :, :wo2]


# ----------------------- pure-JAX reference (bf16-mirrored) ------------------

def _ref_forward(template, search, w, b):
    wk = jnp.transpose(w, (3, 2, 0, 1)).astype(jnp.bfloat16)   # (Cf,Cin,KH,KW)

    def feat(x):
        y = jax.lax.conv_general_dilated(
            x.astype(jnp.bfloat16), wk, (1, 1), 'VALID',
            dimension_numbers=('NCHW', 'OIHW', 'NCHW'),
            preferred_element_type=jnp.float32)
        return jnp.maximum(y + b.reshape(1, -1, 1, 1), 0.0).astype(jnp.bfloat16)

    zf, xf = feat(template), feat(search)
    outs = []
    for i in range(zf.shape[0]):
        o = jax.lax.conv_general_dilated(
            xf[i:i + 1], zf[i:i + 1], (1, 1), 'VALID',
            dimension_numbers=('NCHW', 'OIHW', 'NCHW'),
            preferred_element_type=jnp.float32)
        outs.append(o)
    return jnp.concatenate(outs, axis=0)


# TODO(synk): BCEWithLogitsLoss / _weighted_BCE are training-only losses and
# are not part of the forward pass; intentionally not implemented.

if __name__ == "__main__":
    key = jax.random.PRNGKey(0)
    k1, k2, k3, k4 = jax.random.split(key, 4)
    N, Cin, Cf, KH, KW = 2, 3, 16, 3, 3
    template = jax.random.normal(k1, (N, Cin, 8, 8), jnp.float32)
    search = jax.random.normal(k2, (N, Cin, 16, 16), jnp.float32)
    w = 0.1 * jax.random.normal(k3, (KH, KW, Cin, Cf), jnp.float32)
    b = 0.1 * jax.random.normal(k4, (Cf,), jnp.float32)

    fwd = jax.jit(siamfc_forward)
    score = fwd(template, search, w, b)
    score = jax.block_until_ready(score)

    assert score.shape == (N, 1, 9, 9), score.shape
    ref = _ref_forward(template, search, w, b)
    np.testing.assert_allclose(np.asarray(score), np.asarray(ref),
                               rtol=5e-3, atol=5e-3)
    print("KERNEL_OK")
</pallas_src>

<mosaic_0001>
module attributes {stable_mosaic.version = 11 : i64} {
  func.func @kernel(%arg0: i32, %arg1: i32, %arg2: memref<1x3x512xbf16, #tpu.memory_space<vmem>>, %arg3: memref<9x16x3xf32, #tpu.memory_space<vmem>>, %arg4: memref<16x1xf32, #tpu.memory_space<vmem>>, %arg5: memref<1x16x384xbf16, #tpu.memory_space<vmem>>) attributes {dimension_semantics = [#tpu.dimension_semantics<parallel>, #tpu.dimension_semantics<parallel>], iteration_bounds = array<i64: 2, 1>, scalar_prefetch = 0 : i64, scratch_operands = 0 : i64, tpu.core_type = #tpu.core_type<tc>, window_params = [{transform_indices = @transform_0, window_bounds = array<i64: 1, 3, 512>}, {pipeline_mode = #tpu.pipeline_mode<synchronous>, transform_indices = @transform_1, window_bounds = array<i64: 9, 16, 3>}, {pipeline_mode = #tpu.pipeline_mode<synchronous>, transform_indices = @transform_2, window_bounds = array<i64: 16, 1>}, {transform_indices = @transform_3, window_bounds = array<i64: 1, 16, 384>}]} {
    %c384_i32 = arith.constant 384 : i32
    %0 = arith.muli %arg1, %c384_i32 : i32
    %1 = tpu.assume_multiple %0, 128 : i32
    %c0 = arith.constant 0 : index
    %c0_0 = arith.constant 0 : index
    %2 = arith.index_cast %1 : i32 to index
    %3 = vector.load %arg2[%c0, %c0_0, %2] : memref<1x3x512xbf16, #tpu.memory_space<vmem>>, vector<1x3x512xbf16>
    %4 = vector.shape_cast %3 : vector<1x3x512xbf16> to vector<3x512xbf16>
    %5 = arith.extf %4 : vector<3x512xbf16> to vector<3x512xf32>
    %cst = arith.constant 0.000000e+00 : f32
    %6 = vector.broadcast %cst : f32 to vector<16x384xf32>
    %7 = vector.extract_strided_slice %5 {offsets = [0, 0], sizes = [3, 384], strides = [1, 1]} : vector<3x512xf32> to vector<3x384xf32>
    %c0_1 = arith.constant 0 : index
    %c0_2 = arith.constant 0 : index
    %c0_3 = arith.constant 0 : index
    %8 = vector.load %arg3[%c0_1, %c0_2, %c0_3] : memref<9x16x3xf32, #tpu.memory_space<vmem>>, vector<1x16x3xf32>
    %9 = vector.shape_cast %8 : vector<1x16x3xf32> to vector<16x3xf32>
    %cst_4 = arith.constant dense<0.000000e+00> : vector<16x384xf32>
    %10 = tpu.matmul %9, %7, %cst_4 {dimension_numbers = #tpu.dot_dimension_numbers<[1], [0], [0], [1], [0, 0, 1, 1], [], []>} : vector<16x3xf32>, vector<3x384xf32>, vector<16x384xf32> -> vector<16x384xf32>
    %11 = arith.addf %6, %10 : vector<16x384xf32>
    %12 = vector.extract_strided_slice %5 {offsets = [0, 1], sizes = [3, 384], strides = [1, 1]} : vector<3x512xf32> to vector<3x384xf32>
    %c1 = arith.constant 1 : index
    %c0_5 = arith.constant 0 : index
    %c0_6 = arith.constant 0 : index
    %13 = vector.load %arg3[%c1, %c0_5, %c0_6] : memref<9x16x3xf32, #tpu.memory_space<vmem>>, vector<1x16x3xf32>
    %14 = vector.shape_cast %13 : vector<1x16x3xf32> to vector<16x3xf32>
    %cst_7 = arith.constant dense<0.000000e+00> : vector<16x384xf32>
    %15 = tpu.matmul %14, %12, %cst_7 {dimension_numbers = #tpu.dot_dimension_numbers<[1], [0], [0], [1], [0, 0, 1, 1], [], []>} : vector<16x3xf32>, vector<3x384xf32>, vector<16x384xf32> -> vector<16x384xf32>
    %16 = arith.addf %11, %15 : vector<16x384xf32>
    %17 = vector.extract_strided_slice %5 {offsets = [0, 2], sizes = [3, 384], strides = [1, 1]} : vector<3x512xf32> to vector<3x384xf32>
    %c2 = arith.constant 2 : index
    %c0_8 = arith.constant 0 : index
    %c0_9 = arith.constant 0 : index
    %18 = vector.load %arg3[%c2, %c0_8, %c0_9] : memref<9x16x3xf32, #tpu.memory_space<vmem>>, vector<1x16x3xf32>
    %19 = vector.shape_cast %18 : vector<1x16x3xf32> to vector<16x3xf32>
    %cst_10 = arith.constant dense<0.000000e+00> : vector<16x384xf32>
    %20 = tpu.matmul %19, %17, %cst_10 {dimension_numbers = #tpu.dot_dimension_numbers<[1], [0], [0], [1], [0, 0, 1, 1], [], []>} : vector<16x3xf32>, vector<3x384xf32>, vector<16x384xf32> -> vector<16x384xf32>
    %21 = arith.addf %16, %20 : vector<16x384xf32>
    %22 = vector.extract_strided_slice %5 {offsets = [0, 16], sizes = [3, 384], strides = [1, 1]} : vector<3x512xf32> to vector<3x384xf32>
    %c3 = arith.constant 3 : index
    %c0_11 = arith.constant 0 : index
    %c0_12 = arith.constant 0 : index
    %23 = vector.load %arg3[%c3, %c0_11, %c0_12] : memref<9x16x3xf32, #tpu.memory_space<vmem>>, vector<1x16x3xf32>
    %24 = vector.shape_cast %23 : vector<1x16x3xf32> to vector<16x3xf32>
    %cst_13 = arith.constant dense<0.000000e+00> : vector<16x384xf32>
    %25 = tpu.matmul %24, %22, %cst_13 {dimension_numbers = #tpu.dot_dimension_numbers<[1], [0], [0], [1], [0, 0, 1, 1], [], []>} : vector<16x3xf32>, vector<3x384xf32>, vector<16x384xf32> -> vector<16x384xf32>
    %26 = arith.addf %21, %25 : vector<16x384xf32>
    %27 = vector.extract_strided_slice %5 {offsets = [0, 17], sizes = [3, 384], strides = [1, 1]} : vector<3x512xf32> to vector<3x384xf32>
    %c4 = arith.constant 4 : index
    %c0_14 = arith.constant 0 : index
    %c0_15 = arith.constant 0 : index
    %28 = vector.load %arg3[%c4, %c0_14, %c0_15] : memref<9x16x3xf32, #tpu.memory_space<vmem>>, vector<1x16x3xf32>
    %29 = vector.shape_cast %28 : vector<1x16x3xf32> to vector<16x3xf32>
    %cst_16 = arith.constant dense<0.000000e+00> : vector<16x384xf32>
    %30 = tpu.matmul %29, %27, %cst_16 {dimension_numbers = #tpu.dot_dimension_numbers<[1], [0], [0], [1], [0, 0, 1, 1], [], []>} : vector<16x3xf32>, vector<3x384xf32>, vector<16x384xf32> -> vector<16x384xf32>
    %31 = arith.addf %26, %30 : vector<16x384xf32>
    %32 = vector.extract_strided_slice %5 {offsets = [0, 18], sizes = [3, 384], strides = [1, 1]} : vector<3x512xf32> to vector<3x384xf32>
    %c5 = arith.constant 5 : index
    %c0_17 = arith.constant 0 : index
    %c0_18 = arith.constant 0 : index
    %33 = vector.load %arg3[%c5, %c0_17, %c0_18] : memref<9x16x3xf32, #tpu.memory_space<vmem>>, vector<1x16x3xf32>
    %34 = vector.shape_cast %33 : vector<1x16x3xf32> to vector<16x3xf32>
    %cst_19 = arith.constant dense<0.000000e+00> : vector<16x384xf32>
    %35 = tpu.matmul %34, %32, %cst_19 {dimension_numbers = #tpu.dot_dimension_numbers<[1], [0], [0], [1], [0, 0, 1, 1], [], []>} : vector<16x3xf32>, vector<3x384xf32>, vector<16x384xf32> -> vector<16x384xf32>
    %36 = arith.addf %31, %35 : vector<16x384xf32>
    %37 = vector.extract_strided_slice %5 {offsets = [0, 32], sizes = [3, 384], strides = [1, 1]} : vector<3x512xf32> to vector<3x384xf32>
    %c6 = arith.constant 6 : index
    %c0_20 = arith.constant 0 : index
    %c0_21 = arith.constant 0 : index
    %38 = vector.load %arg3[%c6, %c0_20, %c0_21] : memref<9x16x3xf32, #tpu.memory_space<vmem>>, vector<1x16x3xf32>
    %39 = vector.shape_cast %38 : vector<1x16x3xf32> to vector<16x3xf32>
    %cst_22 = arith.constant dense<0.000000e+00> : vector<16x384xf32>
    %40 = tpu.matmul %39, %37, %cst_22 {dimension_numbers = #tpu.dot_dimension_numbers<[1], [0], [0], [1], [0, 0, 1, 1], [], []>} : vector<16x3xf32>, vector<3x384xf32>, vector<16x384xf32> -> vector<16x384xf32>
    %41 = arith.addf %36, %40 : vector<16x384xf32>
    %42 = vector.extract_strided_slice %5 {offsets = [0, 33], sizes = [3, 384], strides = [1, 1]} : vector<3x512xf32> to vector<3x384xf32>
    %c7 = arith.constant 7 : index
    %c0_23 = arith.constant 0 : index
    %c0_24 = arith.constant 0 : index
    %43 = vector.load %arg3[%c7, %c0_23, %c0_24] : memref<9x16x3xf32, #tpu.memory_space<vmem>>, vector<1x16x3xf32>
    %44 = vector.shape_cast %43 : vector<1x16x3xf32> to vector<16x3xf32>
    %cst_25 = arith.constant dense<0.000000e+00> : vector<16x384xf32>
    %45 = tpu.matmul %44, %42, %cst_25 {dimension_numbers = #tpu.dot_dimension_numbers<[1], [0], [0], [1], [0, 0, 1, 1], [], []>} : vector<16x3xf32>, vector<3x384xf32>, vector<16x384xf32> -> vector<16x384xf32>
    %46 = arith.addf %41, %45 : vector<16x384xf32>
    %47 = vector.extract_strided_slice %5 {offsets = [0, 34], sizes = [3, 384], strides = [1, 1]} : vector<3x512xf32> to vector<3x384xf32>
    %c8 = arith.constant 8 : index
    %c0_26 = arith.constant 0 : index
    %c0_27 = arith.constant 0 : index
    %48 = vector.load %arg3[%c8, %c0_26, %c0_27] : memref<9x16x3xf32, #tpu.memory_space<vmem>>, vector<1x16x3xf32>
    %49 = vector.shape_cast %48 : vector<1x16x3xf32> to vector<16x3xf32>
    %cst_28 = arith.constant dense<0.000000e+00> : vector<16x384xf32>
    %50 = tpu.matmul %49, %47, %cst_28 {dimension_numbers = #tpu.dot_dimension_numbers<[1], [0], [0], [1], [0, 0, 1, 1], [], []>} : vector<16x3xf32>, vector<3x384xf32>, vector<16x384xf32> -> vector<16x384xf32>
    %51 = arith.addf %46, %50 : vector<16x384xf32>
    %c0_29 = arith.constant 0 : index
    %c0_30 = arith.constant 0 : index
    %52 = vector.load %arg4[%c0_29, %c0_30] : memref<16x1xf32, #tpu.memory_space<vmem>>, vector<16x1xf32>
    %53 = vector.broadcast %52 : vector<16x1xf32> to vector<16x384xf32>
    %54 = arith.addf %51, %53 : vector<16x384xf32>
    %cst_31 = arith.constant 0.000000e+00 : f32
    %55 = vector.broadcast %cst_31 : f32 to vector<16x384xf32>
    %56 = arith.maximumf %54, %55 : vector<16x384xf32>
    %57 = arith.truncf %56 : vector<16x384xf32> to vector<16x384xbf16>
    %c0_32 = arith.constant 0 : index
    %c0_33 = arith.constant 0 : index
    %c0_34 = arith.constant 0 : index
    %58 = vector.load %arg5[%c0_32, %c0_33, %c0_34] : memref<1x16x384xbf16, #tpu.memory_space<vmem>>, vector<1x16x384xbf16>
    %59 = vector.shape_cast %58 : vector<1x16x384xbf16> to vector<16x384xbf16>
    %60 = vector.shape_cast %57 : vector<16x384xbf16> to vector<1x16x384xbf16>
    tpu.vector_store %arg5[%c0_32, %c0_33, %c0_34], %60 {strides = array<i32>} : memref<1x16x384xbf16, #tpu.memory_space<vmem>>, vector<1x16x384xbf16>,
    return
  }
  func.func @transform_0(%arg0: i32, %arg1: i32) -> (i32, i32, i32) {
    %c0_i32 = arith.constant 0 : i32
    %c0_i32_0 = arith.constant 0 : i32
    %c0_i32_1 = arith.constant 0 : i32
    return %arg0, %c0_i32, %c0_i32_0 : i32, i32, i32
  }
  func.func @transform_1(%arg0: i32, %arg1: i32) -> (i32, i32, i32) {
    %c0_i32 = arith.constant 0 : i32
    %c0_i32_0 = arith.constant 0 : i32
    %c0_i32_1 = arith.constant 0 : i32
    %c0_i32_2 = arith.constant 0 : i32
    return %c0_i32, %c0_i32_0, %c0_i32_1 : i32, i32, i32
  }
  func.func @transform_2(%arg0: i32, %arg1: i32) -> (i32, i32) {
    %c0_i32 = arith.constant 0 : i32
    %c0_i32_0 = arith.constant 0 : i32
    %c0_i32_1 = arith.constant 0 : i32
    return %c0_i32, %c0_i32_0 : i32, i32
  }
  func.func @transform_3(%arg0: i32, %arg1: i32) -> (i32, i32, i32) {
    %c0_i32 = arith.constant 0 : i32
    %c0_i32_0 = arith.constant 0 : i32
    return %arg0, %c0_i32, %arg1 : i32, i32, i32
  }
}

module attributes {stable_mosaic.version = 11 : i64} {
  func.func @kernel(%arg0: i32, %arg1: i32, %arg2: memref<1x3x256xbf16, #tpu.memory_space<vmem>>, %arg3: memref<9x16x3xf32, #tpu.memory_space<vmem>>, %arg4: memref<16x1xf32, #tpu.memory_space<vmem>>, %arg5: memref<1x16x128xbf16, #tpu.memory_space<vmem>>) attributes {dimension_semantics = [#tpu.dimension_semantics<parallel>, #tpu.dimension_semantics<parallel>], iteration_bounds = array<i64: 2, 1>, scalar_prefetch = 0 : i64, scratch_operands = 0 : i64, tpu.core_type = #tpu.core_type<tc>, window_params = [{transform_indices = @transform_0, window_bounds = array<i64: 1, 3, 256>}, {pipeline_mode = #tpu.pipeline_mode<synchronous>, transform_indices = @transform_1, window_bounds = array<i64: 9, 16, 3>}, {pipeline_mode = #tpu.pipeline_mode<synchronous>, transform_indices = @transform_2, window_bounds = array<i64: 16, 1>}, {transform_indices = @transform_3, window_bounds = array<i64: 1, 16, 128>}]} {
    %c128_i32 = arith.constant 128 : i32
    %0 = arith.muli %arg1, %c128_i32 : i32
    %1 = tpu.assume_multiple %0, 128 : i32
    %c0 = arith.constant 0 : index
    %c0_0 = arith.constant 0 : index
    %2 = arith.index_cast %1 : i32 to index
    %3 = vector.load %arg2[%c0, %c0_0, %2] : memref<1x3x256xbf16, #tpu.memory_space<vmem>>, vector<1x3x256xbf16>
    %4 = vector.shape_cast %3 : vector<1x3x256xbf16> to vector<3x256xbf16>
    %5 = arith.extf %4 : vector<3x256xbf16> to vector<3x256xf32>
    %cst = arith.constant 0.000000e+00 : f32
    %6 = vector.broadcast %cst : f32 to vector<16x128xf32>
    %7 = vector.extract_strided_slice %5 {offsets = [0, 0], sizes = [3, 128], strides = [1, 1]} : vector<3x256xf32> to vector<3x128xf32>
    %c0_1 = arith.constant 0 : index
    %c0_2 = arith.constant 0 : index
    %c0_3 = arith.constant 0 : index
    %8 = vector.load %arg3[%c0_1, %c0_2, %c0_3] : memref<9x16x3xf32, #tpu.memory_space<vmem>>, vector<1x16x3xf32>
    %9 = vector.shape_cast %8 : vector<1x16x3xf32> to vector<16x3xf32>
    %cst_4 = arith.constant dense<0.000000e+00> : vector<16x128xf32>
    %10 = tpu.matmul %9, %7, %cst_4 {dimension_numbers = #tpu.dot_dimension_numbers<[1], [0], [0], [1], [0, 0, 1, 1], [], []>} : vector<16x3xf32>, vector<3x128xf32>, vector<16x128xf32> -> vector<16x128xf32>
    %11 = arith.addf %6, %10 : vector<16x128xf32>
    %12 = vector.extract_strided_slice %5 {offsets = [0, 1], sizes = [3, 128], strides = [1, 1]} : vector<3x256xf32> to vector<3x128xf32>
    %c1 = arith.constant 1 : index
    %c0_5 = arith.constant 0 : index
    %c0_6 = arith.constant 0 : index
    %13 = vector.load %arg3[%c1, %c0_5, %c0_6] : memref<9x16x3xf32, #tpu.memory_space<vmem>>, vector<1x16x3xf32>
    %14 = vector.shape_cast %13 : vector<1x16x3xf32> to vector<16x3xf32>
    %cst_7 = arith.constant dense<0.000000e+00> : vector<16x128xf32>
    %15 = tpu.matmul %14, %12, %cst_7 {dimension_numbers = #tpu.dot_dimension_numbers<[1], [0], [0], [1], [0, 0, 1, 1], [], []>} : vector<16x3xf32>, vector<3x128xf32>, vector<16x128xf32> -> vector<16x128xf32>
    %16 = arith.addf %11, %15 : vector<16x128xf32>
    %17 = vector.extract_strided_slice %5 {offsets = [0, 2], sizes = [3, 128], strides = [1, 1]} : vector<3x256xf32> to vector<3x128xf32>
    %c2 = arith.constant 2 : index
    %c0_8 = arith.constant 0 : index
    %c0_9 = arith.constant 0 : index
    %18 = vector.load %arg3[%c2, %c0_8, %c0_9] : memref<9x16x3xf32, #tpu.memory_space<vmem>>, vector<1x16x3xf32>
    %19 = vector.shape_cast %18 : vector<1x16x3xf32> to vector<16x3xf32>
    %cst_10 = arith.constant dense<0.000000e+00> : vector<16x128xf32>
    %20 = tpu.matmul %19, %17, %cst_10 {dimension_numbers = #tpu.dot_dimension_numbers<[1], [0], [0], [1], [0, 0, 1, 1], [], []>} : vector<16x3xf32>, vector<3x128xf32>, vector<16x128xf32> -> vector<16x128xf32>
    %21 = arith.addf %16, %20 : vector<16x128xf32>
    %22 = vector.extract_strided_slice %5 {offsets = [0, 8], sizes = [3, 128], strides = [1, 1]} : vector<3x256xf32> to vector<3x128xf32>
    %c3 = arith.constant 3 : index
    %c0_11 = arith.constant 0 : index
    %c0_12 = arith.constant 0 : index
    %23 = vector.load %arg3[%c3, %c0_11, %c0_12] : memref<9x16x3xf32, #tpu.memory_space<vmem>>, vector<1x16x3xf32>
    %24 = vector.shape_cast %23 : vector<1x16x3xf32> to vector<16x3xf32>
    %cst_13 = arith.constant dense<0.000000e+00> : vector<16x128xf32>
    %25 = tpu.matmul %24, %22, %cst_13 {dimension_numbers = #tpu.dot_dimension_numbers<[1], [0], [0], [1], [0, 0, 1, 1], [], []>} : vector<16x3xf32>, vector<3x128xf32>, vector<16x128xf32> -> vector<16x128xf32>
    %26 = arith.addf %21, %25 : vector<16x128xf32>
    %27 = vector.extract_strided_slice %5 {offsets = [0, 9], sizes = [3, 128], strides = [1, 1]} : vector<3x256xf32> to vector<3x128xf32>
    %c4 = arith.constant 4 : index
    %c0_14 = arith.constant 0 : index
    %c0_15 = arith.constant 0 : index
    %28 = vector.load %arg3[%c4, %c0_14, %c0_15] : memref<9x16x3xf32, #tpu.memory_space<vmem>>, vector<1x16x3xf32>
    %29 = vector.shape_cast %28 : vector<1x16x3xf32> to vector<16x3xf32>
    %cst_16 = arith.constant dense<0.000000e+00> : vector<16x128xf32>
    %30 = tpu.matmul %29, %27, %cst_16 {dimension_numbers = #tpu.dot_dimension_numbers<[1], [0], [0], [1], [0, 0, 1, 1], [], []>} : vector<16x3xf32>, vector<3x128xf32>, vector<16x128xf32> -> vector<16x128xf32>
    %31 = arith.addf %26, %30 : vector<16x128xf32>
    %32 = vector.extract_strided_slice %5 {offsets = [0, 10], sizes = [3, 128], strides = [1, 1]} : vector<3x256xf32> to vector<3x128xf32>
    %c5 = arith.constant 5 : index
    %c0_17 = arith.constant 0 : index
    %c0_18 = arith.constant 0 : index
    %33 = vector.load %arg3[%c5, %c0_17, %c0_18] : memref<9x16x3xf32, #tpu.memory_space<vmem>>, vector<1x16x3xf32>
    %34 = vector.shape_cast %33 : vector<1x16x3xf32> to vector<16x3xf32>
    %cst_19 = arith.constant dense<0.000000e+00> : vector<16x128xf32>
    %35 = tpu.matmul %34, %32, %cst_19 {dimension_numbers = #tpu.dot_dimension_numbers<[1], [0], [0], [1], [0, 0, 1, 1], [], []>} : vector<16x3xf32>, vector<3x128xf32>, vector<16x128xf32> -> vector<16x128xf32>
    %36 = arith.addf %31, %35 : vector<16x128xf32>
    %37 = vector.extract_strided_slice %5 {offsets = [0, 16], sizes = [3, 128], strides = [1, 1]} : vector<3x256xf32> to vector<3x128xf32>
    %c6 = arith.constant 6 : index
    %c0_20 = arith.constant 0 : index
    %c0_21 = arith.constant 0 : index
    %38 = vector.load %arg3[%c6, %c0_20, %c0_21] : memref<9x16x3xf32, #tpu.memory_space<vmem>>, vector<1x16x3xf32>
    %39 = vector.shape_cast %38 : vector<1x16x3xf32> to vector<16x3xf32>
    %cst_22 = arith.constant dense<0.000000e+00> : vector<16x128xf32>
    %40 = tpu.matmul %39, %37, %cst_22 {dimension_numbers = #tpu.dot_dimension_numbers<[1], [0], [0], [1], [0, 0, 1, 1], [], []>} : vector<16x3xf32>, vector<3x128xf32>, vector<16x128xf32> -> vector<16x128xf32>
    %41 = arith.addf %36, %40 : vector<16x128xf32>
    %42 = vector.extract_strided_slice %5 {offsets = [0, 17], sizes = [3, 128], strides = [1, 1]} : vector<3x256xf32> to vector<3x128xf32>
    %c7 = arith.constant 7 : index
    %c0_23 = arith.constant 0 : index
    %c0_24 = arith.constant 0 : index
    %43 = vector.load %arg3[%c7, %c0_23, %c0_24] : memref<9x16x3xf32, #tpu.memory_space<vmem>>, vector<1x16x3xf32>
    %44 = vector.shape_cast %43 : vector<1x16x3xf32> to vector<16x3xf32>
    %cst_25 = arith.constant dense<0.000000e+00> : vector<16x128xf32>
    %45 = tpu.matmul %44, %42, %cst_25 {dimension_numbers = #tpu.dot_dimension_numbers<[1], [0], [0], [1], [0, 0, 1, 1], [], []>} : vector<16x3xf32>, vector<3x128xf32>, vector<16x128xf32> -> vector<16x128xf32>
    %46 = arith.addf %41, %45 : vector<16x128xf32>
    %47 = vector.extract_strided_slice %5 {offsets = [0, 18], sizes = [3, 128], strides = [1, 1]} : vector<3x256xf32> to vector<3x128xf32>
    %c8 = arith.constant 8 : index
    %c0_26 = arith.constant 0 : index
    %c0_27 = arith.constant 0 : index
    %48 = vector.load %arg3[%c8, %c0_26, %c0_27] : memref<9x16x3xf32, #tpu.memory_space<vmem>>, vector<1x16x3xf32>
    %49 = vector.shape_cast %48 : vector<1x16x3xf32> to vector<16x3xf32>
    %cst_28 = arith.constant dense<0.000000e+00> : vector<16x128xf32>
    %50 = tpu.matmul %49, %47, %cst_28 {dimension_numbers = #tpu.dot_dimension_numbers<[1], [0], [0], [1], [0, 0, 1, 1], [], []>} : vector<16x3xf32>, vector<3x128xf32>, vector<16x128xf32> -> vector<16x128xf32>
    %51 = arith.addf %46, %50 : vector<16x128xf32>
    %c0_29 = arith.constant 0 : index
    %c0_30 = arith.constant 0 : index
    %52 = vector.load %arg4[%c0_29, %c0_30] : memref<16x1xf32, #tpu.memory_space<vmem>>, vector<16x1xf32>
    %53 = vector.broadcast %52 : vector<16x1xf32> to vector<16x128xf32>
    %54 = arith.addf %51, %53 : vector<16x128xf32>
    %cst_31 = arith.constant 0.000000e+00 : f32
    %55 = vector.broadcast %cst_31 : f32 to vector<16x128xf32>
    %56 = arith.maximumf %54, %55 : vector<16x128xf32>
    %57 = arith.truncf %56 : vector<16x128xf32> to vector<16x128xbf16>
    %c0_32 = arith.constant 0 : index
    %c0_33 = arith.constant 0 : index
    %c0_34 = arith.constant 0 : index
    %58 = vector.load %arg5[%c0_32, %c0_33, %c0_34] : memref<1x16x128xbf16, #tpu.memory_space<vmem>>, vector<1x16x128xbf16>
    %59 = vector.shape_cast %58 : vector<1x16x128xbf16> to vector<16x128xbf16>
    %60 = vector.shape_cast %57 : vector<16x128xbf16> to vector<1x16x128xbf16>
    tpu.vector_store %arg5[%c0_32, %c0_33, %c0_34], %60 {strides = array<i32>} : memref<1x16x128xbf16, #tpu.memory_space<vmem>>, vector<1x16x128xbf16>,
    return
  }
  func.func @transform_0(%arg0: i32, %arg1: i32) -> (i32, i32, i32) {
    %c0_i32 = arith.constant 0 : i32
    %c0_i32_0 = arith.constant 0 : i32
    %c0_i32_1 = arith.constant 0 : i32
    return %arg0, %c0_i32, %c0_i32_0 : i32, i32, i32
  }
  func.func @transform_1(%arg0: i32, %arg1: i32) -> (i32, i32, i32) {
    %c0_i32 = arith.constant 0 : i32
    %c0_i32_0 = arith.constant 0 : i32
    %c0_i32_1 = arith.constant 0 : i32
    %c0_i32_2 = arith.constant 0 : i32
    return %c0_i32, %c0_i32_0, %c0_i32_1 : i32, i32, i32
  }
  func.func @transform_2(%arg0: i32, %arg1: i32) -> (i32, i32) {
    %c0_i32 = arith.constant 0 : i32
    %c0_i32_0 = arith.constant 0 : i32
    %c0_i32_1 = arith.constant 0 : i32
    return %c0_i32, %c0_i32_0 : i32, i32
  }
  func.func @transform_3(%arg0: i32, %arg1: i32) -> (i32, i32, i32) {
    %c0_i32 = arith.constant 0 : i32
    %c0_i32_0 = arith.constant 0 : i32
    return %arg0, %c0_i32, %arg1 : i32, i32, i32
  }
}

module attributes {stable_mosaic.version = 11 : i64} {
  func.func @kernel(%arg0: i32, %arg1: memref<1x40x16xbf16, #tpu.memory_space<vmem>>, %arg2: memref<1x16x384xbf16, #tpu.memory_space<vmem>>, %arg3: memref<1x1x256xf32, #tpu.memory_space<vmem>>, %arg4: memref<40x384xf32, #tpu.memory_space<vmem>>) attributes {dimension_semantics = [#tpu.dimension_semantics<parallel>], iteration_bounds = array<i64: 2>, scalar_prefetch = 0 : i64, scratch_operands = 1 : i64, tpu.core_type = #tpu.core_type<tc>, window_params = [{transform_indices = @transform_0, window_bounds = array<i64: 1, 40, 16>}, {transform_indices = @transform_1, window_bounds = array<i64: 1, 16, 384>}, {transform_indices = @transform_2, window_bounds = array<i64: 1, 1, 256>}]} {
    %c0 = arith.constant 0 : index
    %c0_0 = arith.constant 0 : index
    %c0_1 = arith.constant 0 : index
    %0 = vector.load %arg1[%c0, %c0_0, %c0_1] : memref<1x40x16xbf16, #tpu.memory_space<vmem>>, vector<1x40x16xbf16>
    %1 = vector.shape_cast %0 : vector<1x40x16xbf16> to vector<40x16xbf16>
    %c0_2 = arith.constant 0 : index
    %c0_3 = arith.constant 0 : index
    %c0_4 = arith.constant 0 : index
    %2 = vector.load %arg2[%c0_2, %c0_3, %c0_4] : memref<1x16x384xbf16, #tpu.memory_space<vmem>>, vector<1x16x384xbf16>
    %3 = vector.shape_cast %2 : vector<1x16x384xbf16> to vector<16x384xbf16>
    %cst = arith.constant dense<0.000000e+00> : vector<40x384xf32>
    %4 = tpu.matmul %1, %3, %cst {dimension_numbers = #tpu.dot_dimension_numbers<[1], [0], [0], [1], [0, 0, 1, 1], [], []>} : vector<40x16xbf16>, vector<16x384xbf16>, vector<40x384xf32> -> vector<40x384xf32>
    %c0_5 = arith.constant 0 : index
    %c0_6 = arith.constant 0 : index
    %5 = vector.load %arg4[%c0_5, %c0_6] : memref<40x384xf32, #tpu.memory_space<vmem>>, vector<40x384xf32>
    tpu.vector_store %arg4[%c0_5, %c0_6], %4 {strides = array<i32>} : memref<40x384xf32, #tpu.memory_space<vmem>>, vector<40x384xf32>,
    %cst_7 = arith.constant 0.000000e+00 : f32
    %6 = vector.broadcast %cst_7 : f32 to vector<1x256xf32>
    %c0_8 = arith.constant 0 : index
    %c0_9 = arith.constant 0 : index
    %7 = vector.load %arg4[%c0_8, %c0_9] : memref<40x384xf32, #tpu.memory_space<vmem>>, vector<1x256xf32>
    %8 = arith.addf %6, %7 : vector<1x256xf32>
    %c1 = arith.constant 1 : index
    %c1_10 = arith.constant 1 : index
    %9 = vector.load %arg4[%c1, %c1_10] : memref<40x384xf32, #tpu.memory_space<vmem>>, vector<1x256xf32>
    %10 = arith.addf %8, %9 : vector<1x256xf32>
    %c2 = arith.constant 2 : index
    %c2_11 = arith.constant 2 : index
    %11 = vector.load %arg4[%c2, %c2_11] : memref<40x384xf32, #tpu.memory_space<vmem>>, vector<1x256xf32>
    %12 = arith.addf %10, %11 : vector<1x256xf32>
    %c3 = arith.constant 3 : index
    %c3_12 = arith.constant 3 : index
    %13 = vector.load %arg4[%c3, %c3_12] : memref<40x384xf32, #tpu.memory_space<vmem>>, vector<1x256xf32>
    %14 = arith.addf %12, %13 : vector<1x256xf32>
    %c4 = arith.constant 4 : index
    %c4_13 = arith.constant 4 : index
    %15 = vector.load %arg4[%c4, %c4_13] : memref<40x384xf32, #tpu.memory_space<vmem>>, vector<1x256xf32>
    %16 = arith.addf %14, %15 : vector<1x256xf32>
    %c5 = arith.constant 5 : index
    %c5_14 = arith.constant 5 : index
    %17 = vector.load %arg4[%c5, %c5_14] : memref<40x384xf32, #tpu.memory_space<vmem>>, vector<1x256xf32>
    %18 = arith.addf %16, %17 : vector<1x256xf32>
    %c6 = arith.constant 6 : index
    %c16 = arith.constant 16 : index
    %19 = vector.load %arg4[%c6, %c16] : memref<40x384xf32, #tpu.memory_space<vmem>>, vector<1x256xf32>
    %20 = arith.addf %18, %19 : vector<1x256xf32>
    %c7 = arith.constant 7 : index
    %c17 = arith.constant 17 : index
    %21 = vector.load %arg4[%c7, %c17] : memref<40x384xf32, #tpu.memory_space<vmem>>, vector<1x256xf32>
    %22 = arith.addf %20, %21 : vector<1x256xf32>
    %c8 = arith.constant 8 : index
    %c18 = arith.constant 18 : index
    %23 = vector.load %arg4[%c8, %c18] : memref<40x384xf32, #tpu.memory_space<vmem>>, vector<1x256xf32>
    %24 = arith.addf %22, %23 : vector<1x256xf32>
    %c9 = arith.constant 9 : index
    %c19 = arith.constant 19 : index
    %25 = vector.load %arg4[%c9, %c19] : memref<40x384xf32, #tpu.memory_space<vmem>>, vector<1x256xf32>
    %26 = arith.addf %24, %25 : vector<1x256xf32>
    %c10 = arith.constant 10 : index
    %c20 = arith.constant 20 : index
    %27 = vector.load %arg4[%c10, %c20] : memref<40x384xf32, #tpu.memory_space<vmem>>, vector<1x256xf32>
    %28 = arith.addf %26, %27 : vector<1x256xf32>
    %c11 = arith.constant 11 : index
    %c21 = arith.constant 21 : index
    %29 = vector.load %arg4[%c11, %c21] : memref<40x384xf32, #tpu.memory_space<vmem>>, vector<1x256xf32>
    %30 = arith.addf %28, %29 : vector<1x256xf32>
    %c12 = arith.constant 12 : index
    %c32 = arith.constant 32 : index
    %31 = vector.load %arg4[%c12, %c32] : memref<40x384xf32, #tpu.memory_space<vmem>>, vector<1x256xf32>
    %32 = arith.addf %30, %31 : vector<1x256xf32>
    %c13 = arith.constant 13 : index
    %c33 = arith.constant 33 : index
    %33 = vector.load %arg4[%c13, %c33] : memref<40x384xf32, #tpu.memory_space<vmem>>, vector<1x256xf32>
    %34 = arith.addf %32, %33 : vector<1x256xf32>
    %c14 = arith.constant 14 : index
    %c34 = arith.constant 34 : index
    %35 = vector.load %arg4[%c14, %c34] : memref<40x384xf32, #tpu.memory_space<vmem>>, vector<1x256xf32>
    %36 = arith.addf %34, %35 : vector<1x256xf32>
    %c15 = arith.constant 15 : index
    %c35 = arith.constant 35 : index
    %37 = vector.load %arg4[%c15, %c35] : memref<40x384xf32, #tpu.memory_space<vmem>>, vector<1x256xf32>
    %38 = arith.addf %36, %37 : vector<1x256xf32>
    %c16_15 = arith.constant 16 : index
    %c36 = arith.constant 36 : index
    %39 = vector.load %arg4[%c16_15, %c36] : memref<40x384xf32, #tpu.memory_space<vmem>>, vector<1x256xf32>
    %40 = arith.addf %38, %39 : vector<1x256xf32>
    %c17_16 = arith.constant 17 : index
    %c37 = arith.constant 37 : index
    %41 = vector.load %arg4[%c17_16, %c37] : memref<40x384xf32, #tpu.memory_space<vmem>>, vector<1x256xf32>
    %42 = arith.addf %40, %41 : vector<1x256xf32>
    %c18_17 = arith.constant 18 : index
    %c48 = arith.constant 48 : index
    %43 = vector.load %arg4[%c18_17, %c48] : memref<40x384xf32, #tpu.memory_space<vmem>>, vector<1x256xf32>
    %44 = arith.addf %42, %43 : vector<1x256xf32>
    %c19_18 = arith.constant 19 : index
    %c49 = arith.constant 49 : index
    %45 = vector.load %arg4[%c19_18, %c49] : memref<40x384xf32, #tpu.memory_space<vmem>>, vector<1x256xf32>
    %46 = arith.addf %44, %45 : vector<1x256xf32>
    %c20_19 = arith.constant 20 : index
    %c50 = arith.constant 50 : index
    %47 = vector.load %arg4[%c20_19, %c50] : memref<40x384xf32, #tpu.memory_space<vmem>>, vector<1x256xf32>
    %48 = arith.addf %46, %47 : vector<1x256xf32>
    %c21_20 = arith.constant 21 : index
    %c51 = arith.constant 51 : index
    %49 = vector.load %arg4[%c21_20, %c51] : memref<40x384xf32, #tpu.memory_space<vmem>>, vector<1x256xf32>
    %50 = arith.addf %48, %49 : vector<1x256xf32>
    %c22 = arith.constant 22 : index
    %c52 = arith.constant 52 : index
    %51 = vector.load %arg4[%c22, %c52] : memref<40x384xf32, #tpu.memory_space<vmem>>, vector<1x256xf32>
    %52 = arith.addf %50, %51 : vector<1x256xf32>
    %c23 = arith.constant 23 : index
    %c53 = arith.constant 53 : index
    %53 = vector.load %arg4[%c23, %c53] : memref<40x384xf32, #tpu.memory_space<vmem>>, vector<1x256xf32>
    %54 = arith.addf %52, %53 : vector<1x256xf32>
    %c24 = arith.constant 24 : index
    %c64 = arith.constant 64 : index
    %55 = vector.load %arg4[%c24, %c64] : memref<40x384xf32, #tpu.memory_space<vmem>>, vector<1x256xf32>
    %56 = arith.addf %54, %55 : vector<1x256xf32>
    %c25 = arith.constant 25 : index
    %c65 = arith.constant 65 : index
    %57 = vector.load %arg4[%c25, %c65] : memref<40x384xf32, #tpu.memory_space<vmem>>, vector<1x256xf32>
    %58 = arith.addf %56, %57 : vector<1x256xf32>
    %c26 = arith.constant 26 : index
    %c66 = arith.constant 66 : index
    %59 = vector.load %arg4[%c26, %c66] : memref<40x384xf32, #tpu.memory_space<vmem>>, vector<1x256xf32>
    %60 = arith.addf %58, %59 : vector<1x256xf32>
    %c27 = arith.constant 27 : index
    %c67 = arith.constant 67 : index
    %61 = vector.load %arg4[%c27, %c67] : memref<40x384xf32, #tpu.memory_space<vmem>>, vector<1x256xf32>
    %62 = arith.addf %60, %61 : vector<1x256xf32>
    %c28 = arith.constant 28 : index
    %c68 = arith.constant 68 : index
    %63 = vector.load %arg4[%c28, %c68] : memref<40x384xf32, #tpu.memory_space<vmem>>, vector<1x256xf32>
    %64 = arith.addf %62, %63 : vector<1x256xf32>
    %c29 = arith.constant 29 : index
    %c69 = arith.constant 69 : index
    %65 = vector.load %arg4[%c29, %c69] : memref<40x384xf32, #tpu.memory_space<vmem>>, vector<1x256xf32>
    %66 = arith.addf %64, %65 : vector<1x256xf32>
    %c30 = arith.constant 30 : index
    %c80 = arith.constant 80 : index
    %67 = vector.load %arg4[%c30, %c80] : memref<40x384xf32, #tpu.memory_space<vmem>>, vector<1x256xf32>
    %68 = arith.addf %66, %67 : vector<1x256xf32>
    %c31 = arith.constant 31 : index
    %c81 = arith.constant 81 : index
    %69 = vector.load %arg4[%c31, %c81] : memref<40x384xf32, #tpu.memory_space<vmem>>, vector<1x256xf32>
    %70 = arith.addf %68, %69 : vector<1x256xf32>
    %c32_21 = arith.constant 32 : index
    %c82 = arith.constant 82 : index
    %71 = vector.load %arg4[%c32_21, %c82] : memref<40x384xf32, #tpu.memory_space<vmem>>, vector<1x256xf32>
    %72 = arith.addf %70, %71 : vector<1x256xf32>
    %c33_22 = arith.constant 33 : index
    %c83 = arith.constant 83 : index
    %73 = vector.load %arg4[%c33_22, %c83] : memref<40x384xf32, #tpu.memory_space<vmem>>, vector<1x256xf32>
    %74 = arith.addf %72, %73 : vector<1x256xf32>
    %c34_23 = arith.constant 34 : index
    %c84 = arith.constant 84 : index
    %75 = vector.load %arg4[%c34_23, %c84] : memref<40x384xf32, #tpu.memory_space<vmem>>, vector<1x256xf32>
    %76 = arith.addf %74, %75 : vector<1x256xf32>
    %c35_24 = arith.constant 35 : index
    %c85 = arith.constant 85 : index
    %77 = vector.load %arg4[%c35_24, %c85] : memref<40x384xf32, #tpu.memory_space<vmem>>, vector<1x256xf32>
    %78 = arith.addf %76, %77 : vector<1x256xf32>
    %c0_25 = arith.constant 0 : index
    %c0_26 = arith.constant 0 : index
    %c0_27 = arith.constant 0 : index
    %79 = vector.load %arg3[%c0_25, %c0_26, %c0_27] : memref<1x1x256xf32, #tpu.memory_space<vmem>>, vector<1x1x256xf32>
    %80 = vector.shape_cast %79 : vector<1x1x256xf32> to vector<1x256xf32>
    %81 = vector.shape_cast %78 : vector<1x256xf32> to vector<1x1x256xf32>
    tpu.vector_store %arg3[%c0_25, %c0_26, %c0_27], %81 {strides = array<i32>} : memref<1x1x256xf32, #tpu.memory_space<vmem>>, vector<1x1x256xf32>,
    return
  }
  func.func @transform_0(%arg0: i32) -> (i32, i32, i32) {
    %c0_i32 = arith.constant 0 : i32
    %c0_i32_0 = arith.constant 0 : i32
    %c0_i32_1 = arith.constant 0 : i32
    return %arg0, %c0_i32, %c0_i32_0 : i32, i32, i32
  }
  func.func @transform_1(%arg0: i32) -> (i32, i32, i32) {
    %c0_i32 = arith.constant 0 : i32
    %c0_i32_0 = arith.constant 0 : i32
    %c0_i32_1 = arith.constant 0 : i32
    return %arg0, %c0_i32, %c0_i32_0 : i32, i32, i32
  }
  func.func @transform_2(%arg0: i32) -> (i32, i32, i32) {
    %c0_i32 = arith.constant 0 : i32
    %c0_i32_0 = arith.constant 0 : i32
    %c0_i32_1 = arith.constant 0 : i32
    return %arg0, %c0_i32, %c0_i32_0 : i32, i32, i32
  }
}

</mosaic_0001>

<bundles_post_ra>
// kernel: siamfc_forward.3
= control target key start
LH: loop header
LB: loop body
LE: loop exit
PB: predicated region body
PF: predicated region fallthrough
CT: control target
= control target key end

     0   :  { %s1423_s12 = smov 0   ;;  %s1425_s13 = smov 0   ;;  %s1563_s0 = inlined_call_operand.vmem [shape: bf16[2,3,256], index: 0, kind: input, shape index: {}]   ;;  %s1564_s1 = inlined_call_operand.vmem [shape: f32[9,16,3], index: 1, kind: input, shape index: {}]   ;;  %s1565_s2 = inlined_call_operand.vmem [shape: f32[16,1], index: 2, kind: input, shape index: {}]   ;;  %s1566_s3 = inlined_call_operand.vmem [shape: bf16[2,16,128], index: 3, kind: output, shape index: {}]  }
   0x1   :  { %s1427_s14 = smov 0  }
   0x2 LB: > { %s25_s15 = sadd.s32 1, %s1388_s13  ;;  %p1146_p0 = scmp.ge.s32.totalorder %s1392_s14, 1  ;;  %s1392_s14 = sphi %s1427_s14, %s13_s14   ;;  %s1388_s13 = sphi %s1425_s13, %s1568_s13   ;;  %s1384_s12 = sphi %s1423_s12, %s1567_s12  }
   0x3   : > { %p27_p1 = scmp.ge.s32.totalorder %s25_s15, 2  ;;  %p151_p2 = scmp.lt.s32.totalorder %s1392_s14, 3 }
   0x5   : > { %s1570_s15 = smov (%p27_p1, %s25_s15), 0  ;;  %p152_p3 = pnand %p1146_p0, %p151_p2 }
   0x6   : > { %p178_p4 = scmp.lt.s32.totalorder (!%p152_p3), %s1384_s12, 1  ;;  %vm211_vm0 = vcmask (!%p152_p3), 23552   ;;  %v1169_v0 = vld [vmem:[%s1564_s1 + $0x40] sm:$0xff] (!%p152_p3)  ;;  %v1151_v3 = vld [vmem:[%s1564_s1 + $0x10] sm:$0xff] (!%p152_p3)  ;;  %s1394_s24 = smov (!%p152_p3), 119   ;;  %v1038_v6 = vld [vmem:[%s1565_s2 + $0x8] sm:$0xff] (!%p152_p3) }
   0x7   : > { %155 = sbr.rel (%p152_p3) target bundleno = 398 (0x18e), region = 32  ;;  %1256 = vmatprep.mubr.msk.f32.mxu0 (!%p152_p3), %vm211_vm0, %v1169_v0  ;;  %1236 = vmatprep.mubr.msk.f32.mxu1 (!%p152_p3), %vm211_vm0, %v1151_v3  ;;  %s1395_s25 = smov (!%p152_p3), 118   ;;  %v1037_v7 = vld [vmem:[%s1565_s2] sm:$0xff] (!%p152_p3)  ;;  %v1402_v8 = vmov (!%p152_p3), 0   ;;  %vm218_vm1 = vcmask (!%p152_p3), 1042432   ;;  %vm574_vm2 = vcmask (!%p152_p3), 973824  }
   0x8   : > { %s1396_s26 = smov (!%p152_p3), 127   ;;  %s1397_s27 = smov (!%p152_p3), 112   ;;  %1369 = vset.pattern.permute.xlu1 (!%p152_p3), %v1402_v8  ;;  %1368 = vset.pattern.permute.xlu0 (!%p152_p3), %v1402_v8  ;;  %vm668_vm3 = vcmask (!%p152_p3), 965632   ;;  %v1170_v16 = vld [vmem:[%s1564_s1 + $0x48] sm:$0xff] (!%p152_p3)  ;;  %vm209_vm4 = vcmask (!%p152_p3), 1039360   ;;  %v1174_v20 = vld [vmem:[%s1564_s1 + $0x50] sm:$0xff] (!%p152_p3) }
   0x9   : > { %s1398_s28 = smov (!%p152_p3), 111   ;;  %s1399_s29 = smov (!%p152_p3), 126   ;;  %vm762_vm5 = vcmask (!%p152_p3), 916480   ;;  %v1152_v26 = vld [vmem:[%s1564_s1 + $0x18] sm:$0xff] (!%p152_p3)  ;;  %v198_v30 = vld [vmem:[%s1564_s1] sm:$0xff] (!%p152_p3)  ;;  %vm386_vm6 = vcmask (!%p152_p3), 1031168  }
   0xa   : > { %s1400_s30 = smov (!%p152_p3), 110   ;;  %s1401_s4 = smov (!%p152_p3), 120   ;;  %vm856_vm7 = vcmask (!%p152_p3), 908288   ;;  %v1175_v35 = vld [vmem:[%s1564_s1 + $0x58] sm:$0xff] (!%p152_p3)  ;;  %v1179_v37 = vld [vmem:[%s1564_s1 + $0x60] sm:$0xff] (!%p152_p3)  ;;  %vm480_vm8 = vcmask (!%p152_p3), 982016  }
   0xb   : > { %v199_v43 = vld [vmem:[%s1564_s1 + $0x8] sm:$0xff] (!%p152_p3)  ;;  %v1159_v44 = vld [vmem:[%s1564_s1 + $0x20] sm:$0xff] (!%p152_p3)  ;;  %vm950_vm9 = vcmask (!%p152_p3), 900096   ;;  %v1184_v49 = vld [vmem:[%s1564_s1 + $0x70] sm:$0xff] (!%p152_p3) }
   0xc   : > { %v1180_v48 = vld [vmem:[%s1564_s1 + $0x68] sm:$0xff] (!%p152_p3)  ;;  %v1164_v52 = vld [vmem:[%s1564_s1 + $0x30] sm:$0xff] (!%p152_p3)  ;;  %v1185_v53 = vld [vmem:[%s1564_s1 + $0x78] sm:$0xff] (!%p152_p3) }
   0xd   : > { %v1160_v51 = vld [vmem:[%s1564_s1 + $0x28] sm:$0xff] (!%p152_p3)  ;;  %v1189_v54 = vld [vmem:[%s1564_s1 + $0x80] sm:$0xff] (!%p152_p3)  ;;  %v1165_v55 = vld [vmem:[%s1564_s1 + $0x38] sm:$0xff] (!%p152_p3) }
   0xe   : > { %s1572_s12 = smov (!%p178_p4, %s1384_s12), 1  ;;  %v1190_v56 = vld [vmem:[%s1564_s1 + $0x88] sm:$0xff] }
   0xf   : > { %s1198_s18 = sshll.u32 %s1572_s12, 2  ;;  %s1199_s22 = sshll.u32 %s1572_s12, 3 }
  0x10   : > { %s182_s21 = scalar_lea.vmem %s1563_s0, %s1198_s18 }
  0x11   : > { %v196_v1 = vld [vmem:[%s182_s21] sm:$0xf] }
  0x12   : > { %v1451_v2 = vunpack.c.l.bf16 %v196_v1 }
  0x14   : > { %v204_v4 = vcombine.high %v1451_v2, %v1451_v2 }
  0x16   : > { %v1328_v5 = vpack.i.bf16 %v204_v4, %v1451_v2 }
  0x18   : > { %1329 = vrot.lane.b32.xlu0 %v1328_v5, %s1394_s24  ;;  %1339 = vrot.lane.b32.xlu1 %v1328_v5, %s1395_s25  ;;  %s190_s25 = scalar_lea.vmem %s1566_s3, %s1199_s22 }
  0x1c   : > { %1334 = vrot.lane.b32.xlu0 %v1328_v5, %s1396_s26  ;;  %1344 = vrot.lane.b32.xlu1 %v1328_v5, %s1397_s27 }
  0x20   : > { %1354 = vrot.lane.b32.xlu1 %v1328_v5, %s1398_s28  ;;  %1349 = vrot.lane.b32.xlu0 %v1328_v5, %s1399_s29 }
  0x24   : > { %1364 = vrot.lane.b32.xlu1 %v1328_v5, %s1400_s30  ;;  %1359 = vrot.lane.b32.xlu0 %v1328_v5, %s1401_s4 }
  0x28   : > { %1046 = vperm.xlu1 %1369, %v1038_v6   ;;  %1041 = vperm.xlu0 %1368, %v1037_v7  }
  0x8a   : > { %v1330_v9 = vpop.permute.xlu0 %1329  ;;  %v1340_v10 = vpop.permute.xlu1 %1339 }
  0x8b   : > { %v1332_v11 = vunpack.i.h.bf16 %v1330_v9  ;;  %v1331_v12 = vunpack.i.l.bf16 %v1330_v9  ;;  %v1342_v13 = vunpack.i.h.bf16 %v1340_v10  ;;  %v1341_v14 = vunpack.i.l.bf16 %v1340_v10 }
  0x8d   : > { %v575_v15 = vsel %vm574_vm2, %v1331_v12, %v1332_v11  ;;  %v669_v17 = vsel %vm668_vm3, %v1341_v14, %v1342_v13 }
  0x8e   : > { %v1335_v18 = vpop.permute.xlu0 %1334  ;;  %1254 = vmatprep.subr.msk.mxu0 %vm218_vm1, %v575_v15  ;;  %v1345_v19 = vpop.permute.xlu1 %1344 }
  0x8f   : > { %v1337_v21 = vunpack.i.h.bf16 %v1335_v18  ;;  %v1336_v22 = vunpack.i.l.bf16 %v1335_v18  ;;  %1255 = vmatpush3.msk.msra.mxu0 %vm218_vm1, %v575_v15  ;;  %v1347_v23 = vunpack.i.h.bf16 %v1345_v19  ;;  %v1346_v24 = vunpack.i.l.bf16 %v1345_v19 }
  0x90   : > { %1257 = vmatmul.mubr.msk.f32.vlgmr.msra.gmra.mrb[0].mxu0 %vm211_vm0, %v1170_v16  ;;  %1259 = vmatprep.subr.msk.mxu0 %vm218_vm1, %v669_v17 }
  0x91   : > { %1260 = vmatpush3.msk.msra.mxu0 %vm218_vm1, %v669_v17  ;;  %v210_v25 = vsel %vm209_vm4, %v1336_v22, %v1337_v21  ;;  %1261 = vmatprep.mubr.msk.f32.mxu0 %vm211_vm0, %v1174_v20  ;;  %v763_v27 = vsel %vm762_vm5, %v1346_v24, %v1347_v23 }
  0x92   : > { %1234 = vmatprep.subr.msk.mxu1 %vm218_vm1, %v210_v25  ;;  %1264 = vmatprep.subr.msk.mxu0 %vm218_vm1, %v763_v27  ;;  %v1355_v28 = vpop.permute.xlu1 %1354  ;;  %v1350_v29 = vpop.permute.xlu0 %1349 }
  0x93   : > { %1235 = vmatpush3.msk.msra.mxu1 %vm218_vm1, %v210_v25  ;;  %v1357_v31 = vunpack.i.h.bf16 %v1355_v28  ;;  %v1356_v32 = vunpack.i.l.bf16 %v1355_v28  ;;  %v1352_v33 = vunpack.i.h.bf16 %v1350_v29  ;;  %v1351_v34 = vunpack.i.l.bf16 %v1350_v29 }
  0x94   : > { %1237 = vmatmul.mubr.msk.f32.vlgmr.msra.gmra.mrb[0].mxu1 %vm211_vm0, %v1152_v26  ;;  %1239 = vmatprep.subr.msk.mxu1 %vm218_vm1, %v1451_v2 }
  0x95   : > { %1240 = vmatpush3.msk.msra.mxu1 %vm218_vm1, %v1451_v2  ;;  %1241 = vmatprep.mubr.msk.f32.mxu1 %vm211_vm0, %v198_v30  ;;  %v387_v36 = vsel %vm386_vm6, %v1351_v34, %v1352_v33  ;;  %v857_v39 = vsel %vm856_vm7, %v1356_v32, %v1357_v31 }
  0x96   : > { %1244 = vmatprep.subr.msk.mxu1 %vm218_vm1, %v387_v36  ;;  %v1360_v38 = vpop.permute.xlu0 %1359  ;;  %v1365_v42 = vpop.permute.xlu1 %1364 }
  0x97   : > { %v1362_v40 = vunpack.i.h.bf16 %v1360_v38  ;;  %v1361_v41 = vunpack.i.l.bf16 %v1360_v38  ;;  %v1367_v45 = vunpack.i.h.bf16 %v1365_v42  ;;  %v1366_v46 = vunpack.i.l.bf16 %v1365_v42 }
  0x98   : > { %1262 = vmatmul.mubr.msk.f32.vlgmr.msra.gmra.mrb[0].mxu0 %vm211_vm0, %v1175_v35 }
  0x99   : > { %1265 = vmatpush3.msk.msra.mxu0 %vm218_vm1, %v763_v27  ;;  %1266 = vmatprep.mubr.msk.f32.mxu0 %vm211_vm0, %v1179_v37  ;;  %v481_v47 = vsel %vm480_vm8, %v1361_v41, %v1362_v40  ;;  %v951_v50 = vsel %vm950_vm9, %v1366_v46, %v1367_v45 }
  0x9a   : > { %1269 = vmatprep.subr.msk.mxu0 %vm218_vm1, %v857_v39 }
  0x9c   : > { %1242 = vmatmul.mubr.msk.f32.vlgmr.msra.gmra.mrb[0].mxu1 %vm211_vm0, %v199_v43 }
  0x9d   : > { %1245 = vmatpush3.msk.msra.mxu1 %vm218_vm1, %v387_v36  ;;  %1246 = vmatprep.mubr.msk.f32.mxu1 %vm211_vm0, %v1159_v44 }
  0x9e   : > { %1249 = vmatprep.subr.msk.mxu1 %vm218_vm1, %v481_v47 }
  0xa0   : > { %1267 = vmatmul.mubr.msk.f32.vlgmr.msra.gmra.mrb[0].mxu0 %vm211_vm0, %v1180_v48 }
  0xa1   : > { %1270 = vmatpush3.msk.msra.mxu0 %vm218_vm1, %v857_v39  ;;  %1271 = vmatprep.mubr.msk.f32.mxu0 %vm211_vm0, %v1184_v49 }
  0xa2   : > { %1274 = vmatprep.subr.msk.mxu0 %vm218_vm1, %v951_v50 }
  0xa4   : > { %1247 = vmatmul.mubr.msk.f32.vlgmr.msra.gmra.mrb[0].mxu1 %vm211_vm0, %v1160_v51 }
  0xa5   : > { %1250 = vmatpush3.msk.msra.mxu1 %vm218_vm1, %v481_v47  ;;  %1251 = vmatprep.mubr.msk.f32.mxu1 %vm211_vm0, %v1164_v52 }
  0xa7   : > { %v1047_v60 = vpop.permute.xlu1 %1046  ;;  %v1042_v63 = vpop.permute.xlu0 %1041 }
  0xa8   : > { %1272 = vmatmul.mubr.msk.f32.vlgmr.msra.gmra.mrb[0].mxu0 %vm211_vm0, %v1185_v53 }
  0xa9   : > { %1275 = vmatpush3.msk.msra.mxu0 %vm218_vm1, %v951_v50  ;;  %1276 = vmatprep.mubr.msk.f32.mxu0 %vm211_vm0, %v1189_v54 }
  0xac   : > { %1252 = vmatmul.mubr.msk.f32.vlgmr.msra.gmra.mrb[0].mxu1 %vm211_vm0, %v1165_v55 }
  0xb0   : > { %1277 = vmatmul.mubr.msk.f32.vlgmr.msra.gmra.mrb[0].mxu0 %vm211_vm0, %v1190_v56 }
 0x17f   : > { %v1253_v57 = vpop.f32.mrb[0].mxu1 }
 0x180   : > { %v556_v58 = vpop.f32.mrb[1].mxu1 }
 0x183   : > { %v1278_v59 = vpop.f32.mrb[0].mxu0 }
 0x184   : > { %v1279_v61 = vadd.f32 %v1278_v59, %v1253_v57  ;;  %v1026_v62 = vpop.f32.mrb[1].mxu0 }
 0x185   : > { %v1280_v0 = vadd.f32 %v1026_v62, %v556_v58 }
 0x186   : > { %v1050_v1 = vadd.f32 %v1279_v61, %v1047_v60 }
 0x187   : > { %v1049_v2 = vadd.f32 %v1280_v0, %v1042_v63 }
 0x188   : > { %v1052_v3 = vmax.f32 %v1050_v1, 0.0 }
 0x189   : > { %v1051_v4 = vmax.f32 %v1049_v2, 0.0 }
 0x18b   : > { %v1205_v5 = vpack.c.bf16 %v1052_v3, %v1051_v4 }
 0x18d   : > { %1206 = vst [vmem:[%s190_s25] sm:$0xff] %v1205_v5  }
 0x18e PF: > { %s13_s14 = sadd.s32 1, %s1392_s14   ;;  %s1567_s12 = smov %s1388_s13 }
 0x18f   : > { %p10_p5 = scmp.ge.s32.totalorder %s13_s14, 4   ;;  %s1568_s13 = smov %s1570_s15 }
 0x191   :  { %12 = sbr.rel (!%p10_p5) target bundleno = 2 (0x2), region = 71 }

// kernel: siamfc_forward.4
= control target key start
LH: loop header
LB: loop body
LE: loop exit
PB: predicated region body
PF: predicated region fallthrough
CT: control target
= control target key end

     0   :  { %s2328_s12 = smov 0   ;;  %s2330_s13 = smov 0   ;;  %s2588_s0 = inlined_call_operand.vmem [shape: bf16[2,3,512], index: 0, kind: input, shape index: {}]   ;;  %s2589_s1 = inlined_call_operand.vmem [shape: f32[9,16,3], index: 1, kind: input, shape index: {}]   ;;  %s2590_s2 = inlined_call_operand.vmem [shape: f32[16,1], index: 2, kind: input, shape index: {}]   ;;  %s2591_s3 = inlined_call_operand.vmem [shape: bf16[2,16,384], index: 3, kind: output, shape index: {}]  }
   0x1   :  { %s2332_s14 = smov 0  }
   0x2 LB: > { %s25_s15 = sadd.s32 1, %s2292_s13  ;;  %p1983_p0 = scmp.ge.s32.totalorder %s2296_s14, 1  ;;  %s2296_s14 = sphi %s2332_s14, %s13_s14   ;;  %s2292_s13 = sphi %s2330_s13, %s2593_s13   ;;  %s2288_s12 = sphi %s2328_s12, %s2592_s12  }
   0x3   : > { %p27_p1 = scmp.ge.s32.totalorder %s25_s15, 2  ;;  %p151_p2 = scmp.lt.s32.totalorder %s2296_s14, 3 }
   0x5   : > { %s2595_s15 = smov (%p27_p1, %s25_s15), 0  ;;  %p152_p3 = pnand %p1983_p0, %p151_p2 }
   0x6   : > { %p179_p4 = scmp.lt.s32.totalorder (!%p152_p3), %s2288_s12, 1  ;;  %v2298_v0 = vmov (!%p152_p3), 0.0   ;;  %s2299_s20 = smov (!%p152_p3), 127   ;;  %v1848_v7 = vld [vmem:[%s2590_s2] sm:$0xff] (!%p152_p3)  ;;  %v1849_v8 = vld [vmem:[%s2590_s2 + $0x8] sm:$0xff] (!%p152_p3)  ;;  %v2307_v9 = vmov (!%p152_p3), 0  }
   0x7   : > { %155 = sbr.rel (%p152_p3) target bundleno = 441 (0x1b9), region = 32  ;;  %301 = vmatprep.mubr.f32.mxu1 (!%p152_p3), %v2298_v0  ;;  %644 = vmatprep.mubr.f32.mxu0 (!%p152_p3), %v2298_v0  ;;  %s2300_s21 = smov (!%p152_p3), 126   ;;  %vm219_vm0 = vcmask (!%p152_p3), 1039360   ;;  %vm230_vm1 = vcmask (!%p152_p3), 1042432   ;;  %vm564_vm2 = vcmask (!%p152_p3), 1031168   ;;  %v1987_v19 = vld [vmem:[%s2589_s1 + $0x10] sm:$0xff] (!%p152_p3) }
   0x8   : > { %s2301_s22 = smov (!%p152_p3), 112   ;;  %s2302_s23 = smov (!%p152_p3), 111   ;;  %2272 = vset.pattern.permute.xlu0 (!%p152_p3), %v2307_v9  ;;  %2273 = vset.pattern.permute.xlu1 (!%p152_p3), %v2307_v9  ;;  %vm223_vm3 = vcmask (!%p152_p3), 23552   ;;  %v1988_v25 = vld [vmem:[%s2589_s1 + $0x18] sm:$0xff] (!%p152_p3)  ;;  %v2397_v26 = vld [vmem:[%s2589_s1 + $0x20] sm:$0xff] (!%p152_p3)  ;;  %v2411_v30 = vld [vmem:[%s2589_s1 + $0x28] sm:$0xff] (!%p152_p3) }
   0x9   : > { %s2303_s24 = smov (!%p152_p3), 110   ;;  %s2304_s25 = smov (!%p152_p3), 96   ;;  %vm749_vm4 = vcmask (!%p152_p3), 916480   ;;  %v202_v38 = vld [vmem:[%s2589_s1] sm:$0xff] (!%p152_p3)  ;;  %v2431_v39 = vld [vmem:[%s2589_s1 + $0x30] sm:$0xff] (!%p152_p3)  ;;  %vm934_vm5 = vcmask (!%p152_p3), 908288  }
   0xa   : > { %s2305_s26 = smov (!%p152_p3), 95   ;;  %s2306_s27 = smov (!%p152_p3), 94   ;;  %v203_v44 = vld [vmem:[%s2589_s1 + $0x8] sm:$0xff] (!%p152_p3)  ;;  %v2452_v45 = vld [vmem:[%s2589_s1 + $0x38] sm:$0xff] (!%p152_p3)  ;;  %v2466_v49 = vld [vmem:[%s2589_s1 + $0x40] sm:$0xff] (!%p152_p3)  ;;  %vm1119_vm6 = vcmask (!%p152_p3), 900096  }
   0xb   : > { %vm1304_vm7 = vcmask (!%p152_p3), 785408   ;;  %v2022_v59 = vld [vmem:[%s2589_s1 + $0x48] sm:$0xff] (!%p152_p3)  ;;  %v2030_v63 = vld [vmem:[%s2589_s1 + $0x50] sm:$0xff] (!%p152_p3)  ;;  %vm1489_vm8 = vcmask (!%p152_p3), 777216   ;;  %vm1674_vm9 = vcmask (!%p152_p3), 769024  }
   0xe   : > { %s2597_s12 = smov (!%p179_p4, %s2288_s12), 1 }
   0xf   : > { %s2072_s16 = sshll.u32 %s2597_s12, 3 }
  0x10   : > { %s183_s19 = scalar_lea.vmem %s2588_s0, %s2072_s16 }
  0x11   : > { %v199_v1 = vld [vmem:[%s183_s19] sm:$0xff] }
  0x12   : > { %v2354_v2 = vunpack.c.l.bf16 %v199_v1  ;;  %v2356_v3 = vunpack.c.h.bf16 %v199_v1 }
  0x14   : > { %v2360_v4 = vcombine.high %v2354_v2, %v2354_v2  ;;  %v210_v5 = vcombine.high %v2356_v3, %v2356_v3 }
  0x16   : > { %v2232_v6 = vpack.i.bf16 %v2356_v3, %v2360_v4  ;;  %217 = vrot.lane.b32.xlu1 %v210_v5, %s2299_s20 }
  0x18   : > { %2233 = vrot.lane.b32.xlu0 %v2232_v6, %s2299_s20 }
  0x1a   : > { %2238 = vrot.lane.b32.xlu1 %v2232_v6, %s2300_s21 }
  0x1c   : > { %211 = vrot.lane.b32.xlu0 %v2354_v2, %s2299_s20 }
  0x1e   : > { %562 = vrot.lane.b32.xlu1 %v210_v5, %s2300_s21 }
  0x20   : > { %556 = vrot.lane.b32.xlu0 %v2354_v2, %s2300_s21 }
  0x22   : > { %741 = vrot.lane.b32.xlu1 %v2354_v2, %s2301_s22 }
  0x24   : > { %2243 = vrot.lane.b32.xlu0 %v2232_v6, %s2301_s22 }
  0x26   : > { %2248 = vrot.lane.b32.xlu1 %v2232_v6, %s2302_s23 }
  0x28   : > { %747 = vrot.lane.b32.xlu0 %v210_v5, %s2301_s22  ;;  %s2197_s22 = smul.u32 24, %s2597_s12 }
  0x2a   : > { %932 = vrot.lane.b32.xlu1 %v210_v5, %s2302_s23 }
  0x2c   : > { %926 = vrot.lane.b32.xlu0 %v2354_v2, %s2302_s23 }
  0x2e   : > { %1111 = vrot.lane.b32.xlu1 %v2354_v2, %s2303_s24 }
  0x30   : > { %2253 = vrot.lane.b32.xlu0 %v2232_v6, %s2303_s24 }
  0x32   : > { %2258 = vrot.lane.b32.xlu1 %v2232_v6, %s2304_s25 }
  0x34   : > { %1117 = vrot.lane.b32.xlu0 %v210_v5, %s2303_s24 }
  0x36   : > { %1302 = vrot.lane.b32.xlu1 %v210_v5, %s2304_s25 }
  0x38   : > { %1296 = vrot.lane.b32.xlu0 %v2354_v2, %s2304_s25  ;;  %s192_s25 = scalar_lea.vmem %s2591_s3, %s2197_s22 }
  0x3a   : > { %1481 = vrot.lane.b32.xlu1 %v2354_v2, %s2305_s26 }
  0x3c   : > { %2263 = vrot.lane.b32.xlu0 %v2232_v6, %s2305_s26 }
  0x3e   : > { %2268 = vrot.lane.b32.xlu1 %v2232_v6, %s2306_s27 }
  0x40   : > { %1487 = vrot.lane.b32.xlu0 %v210_v5, %s2305_s26 }
  0x42   : > { %1672 = vrot.lane.b32.xlu1 %v210_v5, %s2306_s27  ;;  %v2031_v5 = vld [vmem:[%s2589_s1 + $0x58] sm:$0xff] }
  0x44   : > { %1666 = vrot.lane.b32.xlu0 %v2354_v2, %s2306_s27 }
  0x46   : > { %1857 = vperm.xlu1 %2273, %v1849_v8  }
  0x48   : > { %1852 = vperm.xlu0 %2272, %v1848_v7  }
  0x88   : > { %v218_v10 = vpop.permute.xlu1 %217 }
  0x8a   : > { %v2234_v11 = vpop.permute.xlu0 %2233 }
  0x8b   : > { %v2236_v12 = vunpack.i.h.bf16 %v2234_v11  ;;  %v2235_v13 = vunpack.i.l.bf16 %v2234_v11  ;;  %v2039_v11 = vld [vmem:[%s2589_s1 + $0x60] sm:$0xff] }
  0x8c   : > { %v2239_v14 = vpop.permute.xlu1 %2238 }
  0x8d   : > { %v221_v15 = vsel %vm219_vm0, %v2235_v13, %v2236_v12  ;;  %v2241_v16 = vunpack.i.h.bf16 %v2239_v14  ;;  %v2240_v17 = vunpack.i.l.bf16 %v2239_v14  ;;  %v222_v22 = vsel %vm219_vm0, %v2236_v12, %v218_v10 }
  0x8e   : > { %v212_v18 = vpop.permute.xlu0 %211  ;;  %1989 = vmatprep.subr.msk.mxu1 %vm230_vm1, %v221_v15 }
  0x8f   : > { %v220_v20 = vsel %vm219_vm0, %v212_v18, %v2235_v13  ;;  %v566_v21 = vsel %vm564_vm2, %v2240_v17, %v2241_v16 }
  0x90   : > { %1990 = vmatpush1.msk.msra.mxu1 %vm230_vm1, %v220_v20  ;;  %2005 = vmatprep.subr.msk.mxu0 %vm230_vm1, %v566_v21  ;;  %v563_v23 = vpop.permute.xlu1 %562 }
  0x91   : > { %1991 = vmatmul.mubr.msk.f32.vlgmr.msra.gmra.mrb[0].mxu1 %vm223_vm3, %v1987_v19  ;;  %2104 = vmatprep.subr.msk.mxu1 %vm230_vm1, %v222_v22  ;;  %v567_v41 = vsel %vm564_vm2, %v2241_v16, %v563_v23  ;;  %v2049_v23 = vld [vmem:[%s2589_s1 + $0x78] sm:$0xff] }
  0x92   : > { %v557_v24 = vpop.permute.xlu0 %556  ;;  %2105 = vmatpush3.msk.msra.mxu1 %vm230_vm1, %v222_v22  ;;  %307 = vmatprep.mubr.f32.mxu1 %v2298_v0 }
  0x93   : > { %v565_v27 = vsel %vm564_vm2, %v557_v24, %v2240_v17  ;;  %1996 = vmatprep.subr.msk.mxu1 %vm230_vm1, %v2360_v4  ;;  %v2040_v17 = vld [vmem:[%s2589_s1 + $0x68] sm:$0xff]  ;;  %v2057_v24 = vld [vmem:[%s2589_s1 + $0x80] sm:$0xff] }
  0x94   : > { %2006 = vmatpush1.msk.msra.mxu0 %vm230_vm1, %v565_v27  ;;  %v742_v28 = vpop.permute.xlu1 %741 }
  0x95   : > { %1992 = vmatmul.mubr.msk.f32.gmra.mrb[2].mxu1 %vm223_vm3, %v1988_v25  ;;  %2007 = vmatmul.mubr.msk.f32.vlgmr.msra.gmra.mrb[0].mxu0 %vm223_vm3, %v2397_v26 }
  0x96   : > { %v2244_v29 = vpop.permute.xlu0 %2243  ;;  %2106 = vmatprep.mubr.msk.f32.mxu1 %vm223_vm3, %v1987_v19  ;;  %650 = vmatprep.mubr.f32.mxu0 %v2298_v0  ;;  %v2048_v19 = vld [vmem:[%s2589_s1 + $0x70] sm:$0xff] }
  0x97   : > { %v2246_v31 = vunpack.i.h.bf16 %v2244_v29  ;;  %v2245_v32 = vunpack.i.l.bf16 %v2244_v29 }
  0x98   : > { %v2413_v33 = vpop.permute.xlu1 %2248 }
  0x99   : > { %2107 = vmatmul.mubr.msk.f32.vlgmr.msra.gmra.mrb[4].mxu1 %vm223_vm3, %v1988_v25  ;;  %2008 = vmatmul.mubr.msk.f32.gmra.mrb[2].mxu0 %vm223_vm3, %v2411_v30  ;;  %v750_v34 = vsel %vm749_vm4, %v742_v28, %v2245_v32  ;;  %v751_v35 = vsel %vm749_vm4, %v2245_v32, %v2246_v31  ;;  %v2251_v36 = vunpack.i.h.bf16 %v2413_v33  ;;  %v2250_v37 = vunpack.i.l.bf16 %v2413_v33 }
  0x9a   : > { %1997 = vmatpush1.msk.msra.mxu1 %vm230_vm1, %v2354_v2  ;;  %2014 = vmatprep.subr.msk.mxu0 %vm230_vm1, %v751_v35  ;;  %v748_v40 = vpop.permute.xlu0 %747 }
  0x9b   : > { %465 = vmatprep.mubr.f32.mxu1 %v2298_v0  ;;  %2015 = vmatpush1.msk.msra.mxu0 %vm230_vm1, %v750_v34  ;;  %v936_v43 = vsel %vm934_vm5, %v2250_v37, %v2251_v36  ;;  %v752_v53 = vsel %vm749_vm4, %v2246_v31, %v748_v40 }
  0x9c   : > { %829 = vmatprep.mubr.f32.mxu0 %v2298_v0  ;;  %2109 = vmatprep.subr.msk.mxu1 %vm230_vm1, %v2356_v3  ;;  %v933_v42 = vpop.permute.xlu1 %932 }
  0x9d   : > { %1998 = vmatmul.mubr.msk.f32.vlgmr.msra.gmra.mrb[0].mxu1 %vm223_vm3, %v202_v38  ;;  %2016 = vmatmul.mubr.msk.f32.vlgmr.msra.gmra.mrb[0].mxu0 %vm223_vm3, %v2431_v39  ;;  %v937_v2 = vsel %vm934_vm5, %v2251_v36, %v933_v42 }
  0x9e   : > { %2110 = vmatpush3.msk.msra.mxu1 %vm230_vm1, %v2356_v3  ;;  %471 = vmatprep.mubr.f32.mxu1 %v2298_v0  ;;  %v927_v46 = vpop.permute.xlu0 %926 }
  0x9f   : > { %835 = vmatprep.mubr.f32.mxu0 %v2298_v0  ;;  %v935_v47 = vsel %vm934_vm5, %v927_v46, %v2250_v37  ;;  %2114 = vmatprep.subr.msk.mxu1 %vm230_vm1, %v567_v41 }
  0xa0   : > { %2023 = vmatprep.subr.msk.mxu0 %vm230_vm1, %v936_v43  ;;  %v1112_v48 = vpop.permute.xlu1 %1111 }
  0xa1   : > { %1999 = vmatmul.mubr.msk.f32.gmra.mrb[2].mxu1 %vm223_vm3, %v203_v44  ;;  %2017 = vmatmul.mubr.msk.f32.gmra.mrb[2].mxu0 %vm223_vm3, %v2452_v45 }
  0xa2   : > { %2111 = vmatprep.mubr.msk.f32.mxu1 %vm223_vm3, %v202_v38  ;;  %2024 = vmatpush1.msk.msra.mxu0 %vm230_vm1, %v935_v47  ;;  %v2254_v50 = vpop.permute.xlu0 %2253 }
  0xa3   : > { %1014 = vmatprep.mubr.f32.mxu0 %v2298_v0  ;;  %v2256_v51 = vunpack.i.h.bf16 %v2254_v50  ;;  %v2255_v52 = vunpack.i.l.bf16 %v2254_v50 }
  0xa4   : > { %v2470_v54 = vpop.permute.xlu1 %2258 }
  0xa5   : > { %2112 = vmatmul.mubr.msk.f32.vlgmr.msra.gmra.mrb[4].mxu1 %vm223_vm3, %v203_v44  ;;  %2025 = vmatmul.mubr.msk.f32.vlgmr.msra.gmra.mrb[0].mxu0 %vm223_vm3, %v2466_v49  ;;  %v1120_v55 = vsel %vm1119_vm6, %v1112_v48, %v2255_v52  ;;  %v1121_v56 = vsel %vm1119_vm6, %v2255_v52, %v2256_v51  ;;  %v2261_v57 = vunpack.i.h.bf16 %v2470_v54  ;;  %v2260_v58 = vunpack.i.l.bf16 %v2470_v54 }
  0xa6   : > { %2115 = vmatpush3.msk.msra.mxu1 %vm230_vm1, %v567_v41  ;;  %1020 = vmatprep.mubr.f32.mxu0 %v2298_v0  ;;  %v1118_v60 = vpop.permute.xlu0 %1117 }
  0xa7   : > { %2119 = vmatprep.subr.msk.mxu1 %vm230_vm1, %v752_v53  ;;  %2032 = vmatprep.subr.msk.mxu0 %vm230_vm1, %v1121_v56  ;;  %v1306_v61 = vsel %vm1304_vm7, %v2260_v58, %v2261_v57  ;;  %v1122_v14 = vsel %vm1119_vm6, %v2256_v51, %v1118_v60 }
  0xa8   : > { %2116 = vmatprep.mubr.msk.f32.mxu1 %vm223_vm3, %v2397_v26  ;;  %2033 = vmatpush1.msk.msra.mxu0 %vm230_vm1, %v1120_v55  ;;  %v1303_v62 = vpop.permute.xlu1 %1302  ;;  %v2058_v26 = vld [vmem:[%s2589_s1 + $0x88] sm:$0xff] }
  0xa9   : > { %2026 = vmatmul.mubr.msk.f32.gmra.mrb[2].mxu0 %vm223_vm3, %v2022_v59  ;;  %2041 = vmatprep.subr.msk.mxu0 %vm230_vm1, %v1306_v61  ;;  %v1307_v21 = vsel %vm1304_vm7, %v2261_v57, %v1303_v62 }
  0xaa   : > { %1199 = vmatprep.mubr.f32.mxu0 %v2298_v0  ;;  %v1297_v1 = vpop.permute.xlu0 %1296 }
  0xab   : > { %v1305_v4 = vsel %vm1304_vm7, %v1297_v1, %v2260_v58 }
  0xac   : > { %v1482_v3 = vpop.permute.xlu1 %1481 }
  0xad   : > { %2117 = vmatmul.mubr.msk.f32.vlgmr.msra.gmra.mrb[4].mxu1 %vm223_vm3, %v2411_v30  ;;  %2034 = vmatmul.mubr.msk.f32.vlgmr.msra.gmra.mrb[0].mxu0 %vm223_vm3, %v2030_v63 }
  0xae   : > { %2120 = vmatpush3.msk.msra.mxu1 %vm230_vm1, %v752_v53  ;;  %1205 = vmatprep.mubr.f32.mxu0 %v2298_v0  ;;  %v2264_v6 = vpop.permute.xlu0 %2263 }
  0xaf   : > { %2124 = vmatprep.subr.msk.mxu1 %vm230_vm1, %v937_v2  ;;  %2121 = vmatprep.mubr.msk.f32.mxu1 %vm223_vm3, %v2431_v39  ;;  %v2266_v7 = vunpack.i.h.bf16 %v2264_v6  ;;  %v2265_v8 = vunpack.i.l.bf16 %v2264_v6 }
  0xb0   : > { %2042 = vmatpush1.msk.msra.mxu0 %vm230_vm1, %v1305_v4  ;;  %v2269_v9 = vpop.permute.xlu1 %2268 }
  0xb1   : > { %2035 = vmatmul.mubr.msk.f32.gmra.mrb[2].mxu0 %vm223_vm3, %v2031_v5  ;;  %v1491_v10 = vsel %vm1489_vm8, %v2265_v8, %v2266_v7  ;;  %v2271_v12 = vunpack.i.h.bf16 %v2269_v9  ;;  %v2270_v13 = vunpack.i.l.bf16 %v2269_v9  ;;  %v1490_v16 = vsel %vm1489_vm8, %v1482_v3, %v2265_v8 }
  0xb2   : > { %1384 = vmatprep.mubr.f32.mxu0 %v2298_v0  ;;  %2050 = vmatprep.subr.msk.mxu0 %vm230_vm1, %v1491_v10  ;;  %v1488_v15 = vpop.permute.xlu0 %1487 }
  0xb3   : > { %v1676_v18 = vsel %vm1674_vm9, %v2270_v13, %v2271_v12  ;;  %v1492_v25 = vsel %vm1489_vm8, %v2266_v7, %v1488_v15 }
  0xb4   : > { %v1673_v27 = vpop.permute.xlu1 %1672 }
  0xb5   : > { %2122 = vmatmul.mubr.msk.f32.vlgmr.msra.gmra.mrb[4].mxu1 %vm223_vm3, %v2452_v45  ;;  %2043 = vmatmul.mubr.msk.f32.vlgmr.msra.gmra.mrb[0].mxu0 %vm223_vm3, %v2039_v11  ;;  %v1677_v28 = vsel %vm1674_vm9, %v2271_v12, %v1673_v27 }
  0xb6   : > { %2125 = vmatpush3.msk.msra.mxu1 %vm230_vm1, %v937_v2  ;;  %1390 = vmatprep.mubr.f32.mxu0 %v2298_v0  ;;  %v1667_v20 = vpop.permute.xlu0 %1666 }
  0xb7   : > { %2129 = vmatprep.subr.msk.mxu1 %vm230_vm1, %v1122_v14  ;;  %2126 = vmatprep.mubr.msk.f32.mxu1 %vm223_vm3, %v2466_v49  ;;  %v1675_v22 = vsel %vm1674_vm9, %v1667_v20, %v2270_v13 }
  0xb8   : > { %2051 = vmatpush1.msk.msra.mxu0 %vm230_vm1, %v1490_v16 }
  0xb9   : > { %2044 = vmatmul.mubr.msk.f32.gmra.mrb[2].mxu0 %vm223_vm3, %v2040_v17  ;;  %2059 = vmatprep.subr.msk.mxu0 %vm230_vm1, %v1676_v18 }
  0xba   : > { %1569 = vmatprep.mubr.f32.mxu0 %v2298_v0 }
  0xbd   : > { %2127 = vmatmul.mubr.msk.f32.vlgmr.msra.gmra.mrb[4].mxu1 %vm223_vm3, %v2022_v59  ;;  %2052 = vmatmul.mubr.msk.f32.vlgmr.msra.gmra.mrb[0].mxu0 %vm223_vm3, %v2048_v19 }
  0xbe   : > { %2130 = vmatpush3.msk.msra.mxu1 %vm230_vm1, %v1122_v14  ;;  %1575 = vmatprep.mubr.f32.mxu0 %v2298_v0 }
  0xbf   : > { %2134 = vmatprep.subr.msk.mxu1 %vm230_vm1, %v1307_v21  ;;  %2131 = vmatprep.mubr.msk.f32.mxu1 %vm223_vm3, %v2030_v63 }
  0xc0   : > { %2060 = vmatpush1.msk.msra.mxu0 %vm230_vm1, %v1675_v22 }
  0xc1   : > { %2053 = vmatmul.mubr.msk.f32.gmra.mrb[2].mxu0 %vm223_vm3, %v2049_v23 }
  0xc2   : > { %1754 = vmatprep.mubr.f32.mxu0 %v2298_v0 }
  0xc5   : > { %2132 = vmatmul.mubr.msk.f32.vlgmr.msra.gmra.mrb[4].mxu1 %vm223_vm3, %v2031_v5  ;;  %2061 = vmatmul.mubr.msk.f32.vlgmr.msra.gmra.mrb[0].mxu0 %vm223_vm3, %v2057_v24  ;;  %v1858_v40 = vpop.permute.xlu1 %1857 }
  0xc6   : > { %2135 = vmatpush3.msk.msra.mxu1 %vm230_vm1, %v1307_v21  ;;  %1760 = vmatprep.mubr.f32.mxu0 %v2298_v0 }
  0xc7   : > { %2139 = vmatprep.subr.msk.mxu1 %vm230_vm1, %v1492_v25  ;;  %2136 = vmatprep.mubr.msk.f32.mxu1 %vm223_vm3, %v2039_v11  ;;  %v1853_v33 = vpop.permute.xlu0 %1852 }
  0xc9   : > { %2062 = vmatmul.mubr.msk.f32.gmra.mrb[2].mxu0 %vm223_vm3, %v2058_v26 }
  0xcd   : > { %2137 = vmatmul.mubr.msk.f32.vlgmr.msra.gmra.mrb[4].mxu1 %vm223_vm3, %v2040_v17 }
  0xce   : > { %2140 = vmatpush3.msk.msra.mxu1 %vm230_vm1, %v1492_v25  ;;  %2141 = vmatprep.mubr.msk.f32.mxu1 %vm223_vm3, %v2048_v19 }
  0xcf   : > { %2144 = vmatprep.subr.msk.mxu1 %vm230_vm1, %v1677_v28 }
  0xd5   : > { %2142 = vmatmul.mubr.msk.f32.vlgmr.msra.gmra.mrb[4].mxu1 %vm223_vm3, %v2049_v23 }
  0xd6   : > { %2145 = vmatpush3.msk.msra.mxu1 %vm230_vm1, %v1677_v28  ;;  %2146 = vmatprep.mubr.msk.f32.mxu1 %vm223_vm3, %v2057_v24 }
  0xdd   : > { %2147 = vmatmul.mubr.msk.f32.vlgmr.msra.gmra.mrb[4].mxu1 %vm223_vm3, %v2058_v26 }
 0x170   : > { %v467_v0 = vpop.f32.mrb[0].mxu1 }
 0x171   : > { %v469_v29 = vpop.f32.mrb[1].mxu1 }
 0x174   : > { %v473_v30 = vpop.f32.mrb[2].mxu1 }
 0x175   : > { %v475_v31 = vpop.f32.mrb[3].mxu1 }
 0x198   : > { %v1756_v32 = vpop.f32.mrb[0].mxu0 }
 0x199   : > { %v2149_v34 = vadd.f32 %v1756_v32, %v467_v0  ;;  %v1758_v35 = vpop.f32.mrb[1].mxu0 }
 0x19a   : > { %v2150_v36 = vadd.f32 %v1758_v35, %v469_v29 }
 0x19b   : > { %v1860_v37 = vadd.f32 %v2149_v34, %v1853_v33 }
 0x19c   : > { %v1861_v38 = vadd.f32 %v2150_v36, %v1853_v33  ;;  %v1762_v39 = vpop.f32.mrb[2].mxu0 }
 0x19d   : > { %v1866_v41 = vmax.f32 %v1860_v37, 0.0  ;;  %v2151_v42 = vadd.f32 %v1762_v39, %v473_v30  ;;  %v1764_v43 = vpop.f32.mrb[3].mxu0 }
 0x19e   : > { %v1867_v44 = vmax.f32 %v1861_v38, 0.0  ;;  %v2152_v45 = vadd.f32 %v1764_v43, %v475_v31 }
 0x19f   : > { %v1863_v46 = vadd.f32 %v2151_v42, %v1858_v40 }
 0x1a0   : > { %v2073_v47 = vpack.c.bf16 %v1867_v44, %v1866_v41  ;;  %v1864_v48 = vadd.f32 %v2152_v45, %v1858_v40 }
 0x1a1   : > { %v1869_v49 = vmax.f32 %v1863_v46, 0.0 }
 0x1a2   : > { %1892 = vst [vmem:[%s192_s25] sm:$0xff] %v2073_v47  ;;  %v1870_v50 = vmax.f32 %v1864_v48, 0.0 }
 0x1a4   : > { %v2075_v51 = vpack.c.bf16 %v1870_v50, %v1869_v49 }
 0x1a6   : > { %1894 = vst [vmem:[%s192_s25 + $0xc] sm:$0xff] %v2075_v51 }
 0x1b0   : > { %v2148_v52 = vpop.f32.mrb[4].mxu1 }
 0x1b1   : > { %v1865_v53 = vadd.f32 %v2148_v52, %v1858_v40  ;;  %v1833_v54 = vpop.f32.mrb[5].mxu1 }
 0x1b2   : > { %v1862_v55 = vadd.f32 %v1853_v33, %v1833_v54 }
 0x1b3   : > { %v1871_v56 = vmax.f32 %v1865_v53, 0.0 }
 0x1b4   : > { %v1868_v57 = vmax.f32 %v1862_v55, 0.0 }
 0x1b5   : > { %v2076_v58 = vpack.c.bf16 %v1871_v56, %v1871_v56 }
 0x1b6   : > { %v2074_v59 = vpack.c.bf16 %v1868_v57, %v1868_v57 }
 0x1b7   : > { %1895 = vst [vmem:[%s192_s25 + $0x14] sm:$0xf] %v2076_v58 }
 0x1b8   : > { %1893 = vst [vmem:[%s192_s25 + $0x8] sm:$0xf] %v2074_v59 }
 0x1b9 PF: > { %s13_s14 = sadd.s32 1, %s2296_s14   ;;  %s2592_s12 = smov %s2292_s13 }
 0x1ba   : > { %p10_p5 = scmp.ge.s32.totalorder %s13_s14, 4   ;;  %s2593_s13 = smov %s2595_s15 }
 0x1bc   :  { %12 = sbr.rel (!%p10_p5) target bundleno = 2 (0x2), region = 71 }

// kernel: siamfc_forward.5
= control target key start
LH: loop header
LB: loop body
LE: loop exit
PB: predicated region body
PF: predicated region fallthrough
CT: control target
= control target key end

     0   :  { %s921_s9 = smov 0   ;;  %s949_s0 = inlined_call_operand.vmem [shape: bf16[2,40,16], index: 0, kind: input, shape index: {}]   ;;  %s950_s1 = inlined_call_operand.vmem [shape: bf16[2,16,384], index: 1, kind: input, shape index: {}]   ;;  %s951_s2 = inlined_call_operand.vmem [shape: f32[2,1,256], index: 2, kind: output, shape index: {}]  }
   0x1 LB: > { %s765_s10 = sadd.s32 4294967295, %s866_s9   ;;  %p769_p0 = scmp.ge.s32.totalorder %s866_s9, 1  ;;  %s866_s9 = sphi %s921_s9, %s12_s9  }
   0x2   : > { %p122_p1 = scmp.lt.s32.totalorder %s866_s9, 3 }
   0x4   : > { %p123_p2 = pnand %p769_p0, %p122_p1 }
   0x5   : > { %p148_p3 = scmp.lt.s32.totalorder (!%p123_p2), %s765_s10, 1  ;;  %v868_v0 = vmov (!%p123_p2), 0.0   ;;  %vm869_vm0 = vmmov (!%p123_p2), 0   ;;  %v870_v1 = vmov (!%p123_p2), 0   ;;  %vm201_vm1 = vcmask (!%p123_p2), 130048   ;;  %s871_s19 = smov (!%p123_p2), 125  }
   0x6   : > { %126 = sbr.rel (%p123_p2) target bundleno = 435 (0x1b3), region = 28  ;;  %791 = vmatprep.subr.bf16.mxu1 (!%p123_p2), %v868_v0  ;;  %793 = vmatprep.mubr.msk.bf16.mxu1 (!%p123_p2), %vm869_vm0, %v868_v0  ;;  %s872_s20 = smov (!%p123_p2), 127   ;;  %vm351_vm2 = vcmask (!%p123_p2), 1039360   ;;  %vm361_vm3 = vcmask (!%p123_p2), 1031168   ;;  %vm371_vm4 = vcmask (!%p123_p2), 1022976   ;;  %vm381_vm5 = vcmask (!%p123_p2), 1014784  }
   0x7   : > { %243 = vmatprep.mubr.bf16.mxu0 (!%p123_p2), %v870_v1  ;;  %s873_s21 = smov (!%p123_p2), 124   ;;  %s874_s22 = smov (!%p123_p2), 126   ;;  %vm391_vm6 = vcmask (!%p123_p2), 1006592   ;;  %vm401_vm7 = vcmask (!%p123_p2), 916480   ;;  %vm411_vm8 = vcmask (!%p123_p2), 908288   ;;  %vm421_vm9 = vcmask (!%p123_p2), 900096  }
   0x8   : > { %s875_s23 = smov (!%p123_p2), 112   ;;  %s876_s24 = smov (!%p123_p2), 123   ;;  %vm431_vm10 = vcmask (!%p123_p2), 891904   ;;  %vm441_vm11 = vcmask (!%p123_p2), 883712   ;;  %vm451_vm12 = vcmask (!%p123_p2), 875520   ;;  %vm461_vm13 = vcmask (!%p123_p2), 785408  }
   0x9   : > { %s877_s25 = smov (!%p123_p2), 111   ;;  %s878_s26 = smov (!%p123_p2), 110   ;;  %vm471_vm14 = vcmask (!%p123_p2), 777216   ;;  %vm481_vm15 = vcmask (!%p123_p2), 769024  }
   0xa   : > { %s879_s27 = smov (!%p123_p2), 109   ;;  %s880_s28 = smov (!%p123_p2), 108  }
   0xb   : > { %s881_s29 = smov (!%p123_p2), 107   ;;  %s882_s30 = smov (!%p123_p2), 96  }
   0xc   : > { %s883_s3 = smov (!%p123_p2), 95   ;;  %s884_s4 = smov (!%p123_p2), 94  }
   0xd   : > { %s953_s10 = smov (!%p148_p3, %s765_s10), 1  ;;  %s885_s5 = smov 93  }
   0xe   : > { %s805_s11 = smul.u32 20, %s953_s10  ;;  %s886_s6 = smov 92  }
   0xf   : > { %s806_s12 = smul.u32 24, %s953_s10  ;;  %s887_s7 = smov 91  }
  0x10   : > { %s152_s15 = scalar_lea.vmem %s949_s0, %s805_s11  ;;  %s888_s8 = smov 80  }
  0x11   : > { %s157_s18 = scalar_lea.vmem %s950_s1, %s806_s12  ;;  %v857_v3 = vld [vmem:[%s152_s15] sm:$0xff]   ;;  %v858_v6 = vld [vmem:[%s152_s15 + $0x8] sm:$0xff]   ;;  %v859_v7 = vld [vmem:[%s152_s15 + $0x10] ss:$0 sps:$4 sm:$0xff]   ;;  %s889_s11 = smov 79  }
  0x12   : > { %v853_v2 = vld [vmem:[%s157_s18 + $0x4] ss:$12 sps:$4 sm:$0xff]   ;;  %v855_v4 = vld [vmem:[%s157_s18 + $0x8] ss:$12 sps:$4 sm:$0xff]   ;;  %v856_v5 = vld [vmem:[%s157_s18] ss:$12 sps:$4 sm:$0xff]  }
  0x13   : > { %211 = vmatprep.subr.bf16.mxu0 %v853_v2  ;;  %792 = vmatpush3.bf16.msra.mxu1 %v855_v4  ;;  %s890_s12 = smov 78   ;;  %s891_s13 = smov 77  }
  0x14   : > { %212 = vmatpush1.bf16.msra.mxu0 %v856_v5  ;;  %s892_s14 = smov 76   ;;  %s893_s15 = smov 75  }
  0x15   : > { %s894_s16 = smov 64   ;;  %s895_s17 = smov 63  }
  0x16   : > { %794 = vmatmul.mubr.msk.bf16.vlgmr.msra.gmra.mrb[0].mxu1 %vm201_vm1, %v857_v3  ;;  %s896_s18 = smov 62  }
  0x17   : > { %779 = vmatmul.mubr.msk.bf16.vlgmr.msra.gmra.mrb[0].mxu0 %vm201_vm1, %v857_v3  ;;  %797 = vmatprep.mubr.msk.bf16.mxu1 %vm869_vm0, %v868_v0 }
  0x18   : > { %253 = vmatprep.mubr.bf16.mxu0 %v870_v1 }
  0x1e   : > { %798 = vmatmul.mubr.msk.bf16.gmra.mrb[4].mxu1 %vm201_vm1, %v858_v6 }
  0x1f   : > { %780 = vmatmul.mubr.msk.bf16.gmra.mrb[4].mxu0 %vm201_vm1, %v858_v6  ;;  %801 = vmatprep.mubr.msk.bf16.mxu1 %vm869_vm0, %v868_v0  ;;  %vm491_vm0 = vcmask 760832  }
  0x20   : > { %263 = vmatprep.mubr.bf16.mxu0 %v870_v1 }
  0x26   : > { %802 = vmatmul.mubr.msk.bf16.gmra.mrb[8].mxu1 %vm201_vm1, %v859_v7 }
  0x27   : > { %781 = vmatmul.mubr.msk.bf16.gmra.mrb[8].mxu0 %vm201_vm1, %v859_v7  ;;  %vm501_vm1 = vcmask 752640  }
  0xe9   : > { %v306_v8 = vpop.f32.mrb[0].mxu1 }
  0xea   : > { %330 = vst [vmem:[#allocation2 + $0x10] sm:$0xff] %v306_v8  ;;  %v245_v9 = vpop.f32.mrb[0].mxu0  ;;  %v795_v10 = vpop.f32.mrb[1].mxu1 }
  0xeb   : > { %328 = vst [vmem:[#allocation2] sm:$0xff] %v245_v9  ;;  %v247_v11 = vpop.f32.mrb[1].mxu0  ;;  %v309_v12 = vpop.f32.mrb[2].mxu1 }
  0xec   : > { %329 = vst [vmem:[#allocation2 + $0x8] sm:$0xff] %v247_v11  ;;  %333 = vst [vmem:[#allocation2 + $0x28] sm:$0xff] %v309_v12  ;;  %v249_v13 = vpop.f32.mrb[2].mxu0  ;;  %v796_v14 = vpop.f32.mrb[3].mxu1 }
  0xed   : > { %331 = vst [vmem:[#allocation2 + $0x18] sm:$0xff] %v249_v13  ;;  %v251_v15 = vpop.f32.mrb[3].mxu0 }
  0xee   : > { %332 = vst [vmem:[#allocation2 + $0x20] sm:$0xff] %v251_v15 }
  0xf1   : > { %v314_v16 = vpop.f32.mrb[4].mxu1 }
  0xf2   : > { %v255_v17 = vpop.f32.mrb[4].mxu0  ;;  %336 = vst [vmem:[#allocation2 + $0x40] sm:$0xff] %v314_v16  ;;  %v799_v18 = vpop.f32.mrb[5].mxu1 }
  0xf3   : > { %v366_v19 = vld [vmem:[#allocation2 + $0x3] ss:$8 sm:$0x7]  ;;  %v346_v20 = vld [vmem:[#allocation2 + $0x1] ss:$8 sm:$0x7] }
  0xf4   : > { %334 = vst [vmem:[#allocation2 + $0x30] sm:$0xff] %v255_v17  ;;  %368 = vrot.lane.b32.xlu1 %v366_v19, %s871_s19  ;;  %348 = vrot.lane.b32.xlu0 %v346_v20, %s872_s20  ;;  %v376_v21 = vld [vmem:[#allocation2 + $0x4] ss:$8 sm:$0x7]  ;;  %v257_v23 = vpop.f32.mrb[5].mxu0  ;;  %v317_v24 = vpop.f32.mrb[6].mxu1 }
  0xf5   : > { %v356_v22 = vld [vmem:[#allocation2 + $0x2] ss:$8 sm:$0x7]  ;;  %335 = vst [vmem:[#allocation2 + $0x38] sm:$0xff] %v257_v23  ;;  %v259_v25 = vpop.f32.mrb[6].mxu0  ;;  %339 = vst [vmem:[#allocation2 + $0x58] sm:$0xff] %v317_v24 }
  0xf6   : > { %v800_v26 = vpop.f32.mrb[7].mxu1  ;;  %337 = vst [vmem:[#allocation2 + $0x48] sm:$0xff] %v259_v25  ;;  %v261_v27 = vpop.f32.mrb[7].mxu0  ;;  %v396_v29 = vld [vmem:[#allocation2 + $0x6] ss:$8 sm:$0x7] }
  0xf7   : > { %v386_v30 = vld [vmem:[#allocation2 + $0x5] ss:$8 sm:$0x7]  ;;  %338 = vst [vmem:[#allocation2 + $0x50] sm:$0xff] %v261_v27  ;;  %s897_s19 = smov 61   ;;  %s898_s20 = smov 60  }
  0xf8   : > { %378 = vrot.lane.b32.xlu1 %v376_v21, %s873_s21  ;;  %358 = vrot.lane.b32.xlu0 %v356_v22, %s874_s22  ;;  %v406_v35 = vld [vmem:[#allocation2 + $0x7] ss:$8 sm:$0x7]  ;;  %v416_v38 = vld [vmem:[#allocation2 + $0x18] ss:$8 sm:$0x7] }
  0xf9   : > { %v322_v28 = vpop.f32.mrb[8].mxu1  ;;  %v426_v40 = vld [vmem:[#allocation2 + $0x19] ss:$8 sm:$0x7]  ;;  %s899_s21 = smov 59   ;;  %s900_s22 = smov 48  }
  0xfa   : > { %342 = vst [vmem:[#allocation2 + $0x70] sm:$0xff] %v322_v28  ;;  %v265_v31 = vpop.f32.mrb[8].mxu0  ;;  %v803_v32 = vpop.f32.mrb[9].mxu1  ;;  %v436_v41 = vld [vmem:[#allocation2 + $0x1a] ss:$8 sm:$0x7] }
  0xfb   : > { %340 = vst [vmem:[#allocation2 + $0x60] sm:$0xff] %v265_v31  ;;  %v267_v33 = vpop.f32.mrb[9].mxu0  ;;  %v325_v34 = vpop.f32.mrb[10].mxu1  ;;  %v446_v42 = vld [vmem:[#allocation2 + $0x1b] ss:$8 sm:$0x7] }
  0xfc   : > { %398 = vrot.lane.b32.xlu1 %v396_v29, %s875_s23  ;;  %388 = vrot.lane.b32.xlu0 %v386_v30, %s876_s24  ;;  %341 = vst [vmem:[#allocation2 + $0x68] sm:$0xff] %v267_v33  ;;  %v269_v36 = vpop.f32.mrb[10].mxu0  ;;  %v804_v37 = vpop.f32.mrb[11].mxu1  ;;  %v456_v43 = vld [vmem:[#allocation2 + $0x1c] ss:$8 sm:$0x7] }
  0xfd   : > { %v270_v39 = vpop.f32.mrb[11].mxu0  ;;  %v466_v44 = vld [vmem:[#allocation2 + $0x1d] ss:$8 sm:$0x7]  ;;  %s901_s23 = smov 47   ;;  %s902_s24 = smov 46  }
  0xfe   : > { %v476_v45 = vld [vmem:[#allocation2 + $0x1e] ss:$8 sm:$0x7]  ;;  %v496_v46 = vld [vmem:[#allocation2 + $0x30] ss:$8 sm:$0x7] }
  0xff   : > { %v486_v47 = vld [vmem:[#allocation2 + $0x1f] ss:$8 sm:$0x7]  ;;  %v506_v48 = vld [vmem:[#allocation2 + $0x31] ss:$8 sm:$0x7] }
 0x100   : > { %408 = vrot.lane.b32.xlu0 %v406_v35, %s877_s25  ;;  %418 = vrot.lane.b32.xlu1 %v416_v38, %s878_s26  ;;  %v516_v49 = vld [vmem:[#allocation2 + $0x32] ss:$8 sm:$0x7]  ;;  %v526_v50 = vld [vmem:[#allocation2 + $0x33] ss:$8 sm:$0x7] }
 0x101   : > { %v536_v51 = vld [vmem:[#allocation2 + $0x34] ss:$8 sm:$0x7]  ;;  %v546_v52 = vld [vmem:[#allocation2 + $0x35] ss:$8 sm:$0x7] }
 0x102   : > { %v556_v53 = vld [vmem:[#allocation2 + $0x36] ss:$8 sm:$0x7]  ;;  %v566_v54 = vld [vmem:[#allocation2 + $0x37] ss:$8 sm:$0x7] }
 0x103   : > { %v576_v55 = vld [vmem:[#allocation2 + $0x48] ss:$8 sm:$0x7]  ;;  %v586_v56 = vld [vmem:[#allocation2 + $0x49] ss:$8 sm:$0x7] }
 0x104   : > { %428 = vrot.lane.b32.xlu0 %v426_v40, %s879_s27  ;;  %438 = vrot.lane.b32.xlu1 %v436_v41, %s880_s28  ;;  %v596_v57 = vld [vmem:[#allocation2 + $0x4a] ss:$8 sm:$0x7]  ;;  %v606_v58 = vld [vmem:[#allocation2 + $0x4b] ss:$8 sm:$0x7] }
 0x105   : > { %v616_v59 = vld [vmem:[#allocation2 + $0x4c] ss:$8 sm:$0x7]  ;;  %v626_v60 = vld [vmem:[#allocation2 + $0x4d] ss:$8 sm:$0x7] }
 0x106   : > { %v636_v61 = vld [vmem:[#allocation2 + $0x4e] ss:$8 sm:$0x7]  ;;  %v656_v62 = vld [vmem:[#allocation2 + $0x60] ss:$8 sm:$0x7] }
 0x107   : > { %v646_v63 = vld [vmem:[#allocation2 + $0x4f] ss:$8 sm:$0x7]  ;;  %v666_v0 = vld [vmem:[#allocation2 + $0x61] ss:$8 sm:$0x7] }
 0x108   : > { %448 = vrot.lane.b32.xlu0 %v446_v42, %s881_s29  ;;  %458 = vrot.lane.b32.xlu1 %v456_v43, %s882_s30  ;;  %v676_v1 = vld [vmem:[#allocation2 + $0x62] ss:$8 sm:$0x7]  ;;  %s903_s25 = smov 45   ;;  %s904_s26 = smov 44  }
 0x109   : > { %v686_v2 = vld [vmem:[#allocation2 + $0x63] ss:$8 sm:$0x7]  ;;  %s905_s27 = smov 43   ;;  %s772_s28 = sshll.u32 %s953_s10, 1 }
 0x10a   : > { %v343_v10 = vld [vmem:[#allocation2] ss:$8 sm:$0x3] }
 0x10c   : > { %468 = vrot.lane.b32.xlu0 %v466_v44, %s883_s3  ;;  %478 = vrot.lane.b32.xlu1 %v476_v45, %s884_s4  ;;  %s161_s3 = scalar_lea.vmem %s951_s2, %s772_s28 }
 0x110   : > { %488 = vrot.lane.b32.xlu0 %v486_v47, %s885_s5  ;;  %498 = vrot.lane.b32.xlu1 %v496_v46, %s886_s6 }
 0x114   : > { %508 = vrot.lane.b32.xlu0 %v506_v48, %s887_s7  ;;  %518 = vrot.lane.b32.xlu1 %v516_v49, %s888_s8 }
 0x118   : > { %528 = vrot.lane.b32.xlu0 %v526_v50, %s889_s11  ;;  %538 = vrot.lane.b32.xlu1 %v536_v51, %s890_s12 }
 0x11c   : > { %548 = vrot.lane.b32.xlu0 %v546_v52, %s891_s13  ;;  %558 = vrot.lane.b32.xlu1 %v556_v53, %s892_s14 }
 0x120   : > { %568 = vrot.lane.b32.xlu0 %v566_v54, %s893_s15  ;;  %578 = vrot.lane.b32.xlu1 %v576_v55, %s894_s16 }
 0x124   : > { %588 = vrot.lane.b32.xlu0 %v586_v56, %s895_s17  ;;  %598 = vrot.lane.b32.xlu1 %v596_v57, %s896_s18 }
 0x128   : > { %608 = vrot.lane.b32.xlu0 %v606_v58, %s897_s19  ;;  %618 = vrot.lane.b32.xlu1 %v616_v59, %s898_s20 }
 0x12c   : > { %628 = vrot.lane.b32.xlu0 %v626_v60, %s899_s21  ;;  %638 = vrot.lane.b32.xlu1 %v636_v61, %s900_s22 }
 0x130   : > { %648 = vrot.lane.b32.xlu0 %v646_v63, %s901_s23  ;;  %658 = vrot.lane.b32.xlu1 %v656_v62, %s902_s24 }
 0x134   : > { %668 = vrot.lane.b32.xlu0 %v666_v0, %s903_s25  ;;  %678 = vrot.lane.b32.xlu1 %v676_v1, %s904_s26 }
 0x138   : > { %688 = vrot.lane.b32.xlu0 %v686_v2, %s905_s27 }
 0x166   : > { %v369_v3 = vpop.permute.xlu1 %368  ;;  %v349_v4 = vpop.permute.xlu0 %348 }
 0x167   : > { %v350_v5 = vrot.slane %v349_v4, 1  ;;  %v370_v9 = vrot.slane %v369_v3, 1 }
 0x169   : > { %v352_v6 = vsel %vm351_vm2, %v349_v4, %v350_v5  ;;  %v372_v18 = vsel %vm371_vm4, %v369_v3, %v370_v9  ;;  %vm511_vm2 = vcmask 744448   ;;  %vm531_vm4 = vcmask 646144  }
 0x16a   : > { %v379_v7 = vpop.permute.xlu1 %378  ;;  %v359_v8 = vpop.permute.xlu0 %358  ;;  %v354_v12 = vadd.f32 %v352_v6, %v343_v10 }
 0x16b   : > { %v360_v11 = vrot.slane %v359_v8, 1  ;;  %v380_v13 = vrot.slane %v379_v7, 1 }
 0x16d   : > { %v362_v14 = vsel %vm361_vm3, %v359_v8, %v360_v11  ;;  %v382_v21 = vsel %vm381_vm5, %v379_v7, %v380_v13  ;;  %vm521_vm3 = vcmask 654336   ;;  %vm541_vm5 = vcmask 637952  }
 0x16e   : > { %v364_v15 = vadd.f32 %v362_v14, %v354_v12  ;;  %v399_v16 = vpop.permute.xlu1 %398  ;;  %v389_v17 = vpop.permute.xlu0 %388 }
 0x16f   : > { %v390_v19 = vrot.slane %v389_v17, 1  ;;  %v400_v22 = vrot.slane %v399_v16, 1 }
 0x170   : > { %v374_v20 = vadd.f32 %v372_v18, %v364_v15 }
 0x171   : > { %v392_v26 = vsel %vm391_vm6, %v389_v17, %v390_v19  ;;  %v402_v29 = vsel %vm401_vm7, %v399_v16, %v400_v22  ;;  %vm551_vm6 = vcmask 629760   ;;  %vm561_vm7 = vcmask 621568  }
 0x172   : > { %v384_v23 = vadd.f32 %v382_v21, %v374_v20  ;;  %v409_v24 = vpop.permute.xlu0 %408  ;;  %v419_v25 = vpop.permute.xlu1 %418 }
 0x173   : > { %v410_v27 = vrot.slane %v409_v24, 1  ;;  %v420_v30 = vrot.slane %v419_v25, 1 }
 0x174   : > { %v394_v28 = vadd.f32 %v392_v26, %v384_v23 }
 0x175   : > { %v412_v34 = vsel %vm411_vm8, %v409_v24, %v410_v27  ;;  %v422_v37 = vsel %vm421_vm9, %v419_v25, %v420_v30  ;;  %vm571_vm8 = vcmask 613376   ;;  %vm581_vm9 = vcmask 523264  }
 0x176   : > { %v404_v31 = vadd.f32 %v402_v29, %v394_v28  ;;  %v429_v32 = vpop.permute.xlu0 %428  ;;  %v439_v33 = vpop.permute.xlu1 %438 }
 0x177   : > { %v430_v35 = vrot.slane %v429_v32, 1  ;;  %v440_v38 = vrot.slane %v439_v33, 1 }
 0x178   : > { %v414_v36 = vadd.f32 %v412_v34, %v404_v31 }
 0x179   : > { %v432_v42 = vsel %vm431_vm10, %v429_v32, %v430_v35  ;;  %v442_v45 = vsel %vm441_vm11, %v439_v33, %v440_v38  ;;  %vm591_vm10 = vcmask 515072   ;;  %vm601_vm11 = vcmask 506880  }
 0x17a   : > { %v424_v39 = vadd.f32 %v422_v37, %v414_v36  ;;  %v449_v40 = vpop.permute.xlu0 %448  ;;  %v459_v41 = vpop.permute.xlu1 %458 }
 0x17b   : > { %v450_v43 = vrot.slane %v449_v40, 1  ;;  %v460_v46 = vrot.slane %v459_v41, 1 }
 0x17c   : > { %v434_v44 = vadd.f32 %v432_v42, %v424_v39 }
 0x17d   : > { %v452_v50 = vsel %vm451_vm12, %v449_v40, %v450_v43  ;;  %v462_v53 = vsel %vm461_vm13, %v459_v41, %v460_v46  ;;  %vm611_vm12 = vcmask 498688   ;;  %vm621_vm13 = vcmask 490496  }
 0x17e   : > { %v444_v47 = vadd.f32 %v442_v45, %v434_v44  ;;  %v469_v48 = vpop.permute.xlu0 %468  ;;  %v479_v49 = vpop.permute.xlu1 %478 }
 0x17f   : > { %v470_v51 = vrot.slane %v469_v48, 1  ;;  %v480_v54 = vrot.slane %v479_v49, 1 }
 0x180   : > { %v454_v52 = vadd.f32 %v452_v50, %v444_v47 }
 0x181   : > { %v472_v58 = vsel %vm471_vm14, %v469_v48, %v470_v51  ;;  %v482_v61 = vsel %vm481_vm15, %v479_v49, %v480_v54  ;;  %vm631_vm14 = vcmask 482304   ;;  %vm641_vm15 = vcmask 392192  }
 0x182   : > { %v464_v55 = vadd.f32 %v462_v53, %v454_v52  ;;  %v489_v56 = vpop.permute.xlu0 %488  ;;  %v499_v57 = vpop.permute.xlu1 %498 }
 0x183   : > { %v490_v59 = vrot.slane %v489_v56, 1  ;;  %v500_v62 = vrot.slane %v499_v57, 1 }
 0x184   : > { %v474_v60 = vadd.f32 %v472_v58, %v464_v55 }
 0x185   : > { %v492_v2 = vsel %vm491_vm0, %v489_v56, %v490_v59  ;;  %v502_v5 = vsel %vm501_vm1, %v499_v57, %v500_v62  ;;  %vm651_vm0 = vcmask 384000   ;;  %vm661_vm1 = vcmask 375808  }
 0x186   : > { %v484_v63 = vadd.f32 %v482_v61, %v474_v60  ;;  %v509_v0 = vpop.permute.xlu0 %508  ;;  %v519_v1 = vpop.permute.xlu1 %518 }
 0x187   : > { %v510_v3 = vrot.slane %v509_v0, 1  ;;  %v520_v6 = vrot.slane %v519_v1, 1 }
 0x188   : > { %v494_v4 = vadd.f32 %v492_v2, %v484_v63 }
 0x189   : > { %v512_v10 = vsel %vm511_vm2, %v509_v0, %v510_v3  ;;  %v522_v13 = vsel %vm521_vm3, %v519_v1, %v520_v6  ;;  %vm671_vm2 = vcmask 367616   ;;  %vm681_vm3 = vcmask 359424  }
 0x18a   : > { %v504_v7 = vadd.f32 %v502_v5, %v494_v4  ;;  %v529_v8 = vpop.permute.xlu0 %528  ;;  %v539_v9 = vpop.permute.xlu1 %538 }
 0x18b   : > { %v530_v11 = vrot.slane %v529_v8, 1  ;;  %v540_v14 = vrot.slane %v539_v9, 1 }
 0x18c   : > { %v514_v12 = vadd.f32 %v512_v10, %v504_v7  ;;  %v695_v10 = vlaneseq }
 0x18d   : > { %v532_v18 = vsel %vm531_vm4, %v529_v8, %v530_v11  ;;  %v542_v21 = vsel %vm541_vm5, %v539_v9, %v540_v14  ;;  %vm691_vm4 = vcmask 351232  }
 0x18e   : > { %v524_v15 = vadd.f32 %v522_v13, %v514_v12  ;;  %v549_v16 = vpop.permute.xlu0 %548  ;;  %v559_v17 = vpop.permute.xlu1 %558  ;;  %vm697_vm5 = vcmp.lt.s32.totalorder %v695_v10, 256 }
 0x18f   : > { %v550_v19 = vrot.slane %v549_v16, 1  ;;  %v560_v22 = vrot.slane %v559_v17, 1 }
 0x190   : > { %v534_v20 = vadd.f32 %v532_v18, %v524_v15 }
 0x191   : > { %v552_v26 = vsel %vm551_vm6, %v549_v16, %v550_v19  ;;  %v562_v29 = vsel %vm561_vm7, %v559_v17, %v560_v22 }
 0x192   : > { %v544_v23 = vadd.f32 %v542_v21, %v534_v20  ;;  %v569_v24 = vpop.permute.xlu0 %568  ;;  %v579_v25 = vpop.permute.xlu1 %578 }
 0x193   : > { %v570_v27 = vrot.slane %v569_v24, 1  ;;  %v580_v30 = vrot.slane %v579_v25, 1 }
 0x194   : > { %v554_v28 = vadd.f32 %v552_v26, %v544_v23 }
 0x195   : > { %v572_v34 = vsel %vm571_vm8, %v569_v24, %v570_v27  ;;  %v582_v37 = vsel %vm581_vm9, %v579_v25, %v580_v30 }
 0x196   : > { %v564_v31 = vadd.f32 %v562_v29, %v554_v28  ;;  %v589_v32 = vpop.permute.xlu0 %588  ;;  %v599_v33 = vpop.permute.xlu1 %598 }
 0x197   : > { %v590_v35 = vrot.slane %v589_v32, 1  ;;  %v600_v38 = vrot.slane %v599_v33, 1 }
 0x198   : > { %v574_v36 = vadd.f32 %v572_v34, %v564_v31 }
 0x199   : > { %v592_v42 = vsel %vm591_vm10, %v589_v32, %v590_v35  ;;  %v602_v45 = vsel %vm601_vm11, %v599_v33, %v600_v38 }
 0x19a   : > { %v584_v39 = vadd.f32 %v582_v37, %v574_v36  ;;  %v609_v40 = vpop.permute.xlu0 %608  ;;  %v619_v41 = vpop.permute.xlu1 %618 }
 0x19b   : > { %v610_v43 = vrot.slane %v609_v40, 1  ;;  %v620_v46 = vrot.slane %v619_v41, 1 }
 0x19c   : > { %v594_v44 = vadd.f32 %v592_v42, %v584_v39 }
 0x19d   : > { %v612_v50 = vsel %vm611_vm12, %v609_v40, %v610_v43  ;;  %v622_v53 = vsel %vm621_vm13, %v619_v41, %v620_v46 }
 0x19e   : > { %v604_v47 = vadd.f32 %v602_v45, %v594_v44  ;;  %v629_v48 = vpop.permute.xlu0 %628  ;;  %v639_v49 = vpop.permute.xlu1 %638 }
 0x19f   : > { %v630_v51 = vrot.slane %v629_v48, 1  ;;  %v640_v54 = vrot.slane %v639_v49, 1 }
 0x1a0   : > { %v614_v52 = vadd.f32 %v612_v50, %v604_v47 }
 0x1a1   : > { %v632_v58 = vsel %vm631_vm14, %v629_v48, %v630_v51  ;;  %v642_v61 = vsel %vm641_vm15, %v639_v49, %v640_v54 }
 0x1a2   : > { %v624_v55 = vadd.f32 %v622_v53, %v614_v52  ;;  %v649_v56 = vpop.permute.xlu0 %648  ;;  %v659_v57 = vpop.permute.xlu1 %658 }
 0x1a3   : > { %v650_v59 = vrot.slane %v649_v56, 1  ;;  %v660_v62 = vrot.slane %v659_v57, 1 }
 0x1a4   : > { %v634_v60 = vadd.f32 %v632_v58, %v624_v55 }
 0x1a5   : > { %v652_v2 = vsel %vm651_vm0, %v649_v56, %v650_v59  ;;  %v662_v5 = vsel %vm661_vm1, %v659_v57, %v660_v62 }
 0x1a6   : > { %v644_v63 = vadd.f32 %v642_v61, %v634_v60  ;;  %v669_v0 = vpop.permute.xlu0 %668  ;;  %v679_v1 = vpop.permute.xlu1 %678 }
 0x1a7   : > { %v670_v3 = vrot.slane %v669_v0, 1  ;;  %v680_v6 = vrot.slane %v679_v1, 1 }
 0x1a8   : > { %v654_v4 = vadd.f32 %v652_v2, %v644_v63 }
 0x1a9   : > { %v672_v9 = vsel %vm671_vm2, %v669_v0, %v670_v3  ;;  %v682_v13 = vsel %vm681_vm3, %v679_v1, %v680_v6 }
 0x1aa   : > { %v664_v7 = vadd.f32 %v662_v5, %v654_v4  ;;  %v689_v8 = vpop.permute.xlu0 %688 }
 0x1ab   : > { %v690_v11 = vrot.slane %v689_v8, 1 }
 0x1ac   : > { %v674_v12 = vadd.f32 %v672_v9, %v664_v7 }
 0x1ad   : > { %v692_v15 = vsel %vm691_vm4, %v689_v8, %v690_v11 }
 0x1ae   : > { %v684_v14 = vadd.f32 %v682_v13, %v674_v12 }
 0x1b0   : > { %v694_v16 = vadd.f32 %v692_v15, %v684_v14 }
 0x1b2   : > { %699 = vst.msk [vmem:[%s161_s3] sm:$0x3] %vm697_vm5, %v694_v16 }
 0x1b3 PF: > { %s12_s9 = sadd.s32 1, %s866_s9  }
 0x1b4   : > { %p9_p4 = scmp.ge.s32.totalorder %s12_s9, 4  }
 0x1b6   :  { %11 = sbr.rel (!%p9_p4) target bundleno = 1 (0x1), region = 96 }

</bundles_post_ra>
